<compile_context>
chip_gen: v6e
topology: v6e:2x2x1
jax: 0.10.0
libtpu: 0.0.40
codegen_flags: <defaults>
</compile_context>

<pallas_src>
import math
from functools import partial

import jax
import jax.numpy as jnp
from jax import lax
from jax.experimental import pallas as pl
from jax.experimental.pallas import tpu as pltpu

_EPS = 1e-5     # torch.nn.LayerNorm default eps
_VPAD = 128     # lane-dense padded width for the tiny n_objective value output


def _gelu_exact(x):
    # torch.nn.GELU() default = exact (erf) formulation; kept in f32 on the VPU/EUP.
    return 0.5 * x * (1.0 + lax.erf(x * 0.7071067811865476))


def _ln(x, g, b):
    mu = jnp.mean(x, axis=-1, keepdims=True)
    var = jnp.mean(jnp.square(x - mu), axis=-1, keepdims=True)
    return (x - mu) * lax.rsqrt(var + _EPS) * g + b


# --------------------------- fused encoder kernel ----------------------------

def _encoder_kernel(
    x_ref,
    enc_g_ref, enc_b_ref, enc_w_ref, enc_bias_ref,
    ln_g_ref, ln_b_ref,
    ln1_g_ref, ln1_b_ref, ln2_g_ref, ln2_b_ref,
    wqkv_ref, bqkv_ref, wprojh_ref, bproj_ref,
    wfc1_ref, bfc1_ref, wfc2_ref, bfc2_ref,
    hw1_ref, hb1_ref, hln_g_ref, hln_b_ref, hw2_ref, hb2_ref, sel_ref,
    v_ref, rep_ref,
    *, n_block, n_head, n_obj, L, D):
    f32 = jnp.float32
    bf16 = jnp.bfloat16
    Dh = D // n_head
    scale = 1.0 / math.sqrt(Dh)

    # ---- obs/state encoder: LN -> Linear (bf16 MXU, f32 acc) -> GELU -> LN ----
    x = x_ref[0].astype(f32)                                        # (L, F_in)
    x = _ln(x, enc_g_ref[...], enc_b_ref[...])
    x = jnp.dot(x.astype(bf16), enc_w_ref[...],
                preferred_element_type=f32) + enc_bias_ref[...]
    x = _gelu_exact(x)
    x = _ln(x, ln_g_ref[...], ln_b_ref[...])

    # ---- transformer EncodeBlocks (fori_loop: bounded live ranges, dynamic
    #      leading-dim ref indexing into the stacked per-block weights) --------
    def block_body(blk, x):
        # Fused QKV projection: one (L, D) x (D, 3D) bf16 matmul, f32 acc.
        qkv = jnp.dot(x.astype(bf16), wqkv_ref[blk],
                      preferred_element_type=f32) + bqkv_ref[blk]   # (L, 3D) f32

        # Head-major (H, L, Dh) layout: static lane slices stacked once along a
        # new leading axis -> all head attention below is batched einsums
        # (no per-head matmul loop, no lane concat on the way out).
        q = jnp.stack([qkv[:, h * Dh:(h + 1) * Dh]
                       for h in range(n_head)]) * scale             # (H, L, Dh)
        k = jnp.stack([qkv[:, D + h * Dh:D + (h + 1) * Dh]
                       for h in range(n_head)])
        v = jnp.stack([qkv[:, 2 * D + h * Dh:2 * D + (h + 1) * Dh]
                       for h in range(n_head)])

        # Per-batch attention: this grid step only sees its own batch's rows,
        # so there is no cross-batch mask at all. Softmax kept fully in f32.
        s = jnp.einsum('hqd,hkd->hqk', q, k, preferred_element_type=f32)
        s = s - jnp.max(s, axis=-1, keepdims=True)
        p = jnp.exp(s)
        p = p * pl.reciprocal(jnp.sum(p, axis=-1, keepdims=True), approx=False)
        y = jnp.einsum('hqk,hkd->hqd', p, v,
                       preferred_element_type=f32)                  # (H, L, Dh)

        # Head merge + output proj fused: per-head proj weights (H, Dh, D),
        # batched matmul then sum over heads (no lane concat / transpose).
        y = jnp.einsum('hld,hdo->hlo', y.astype(bf16), wprojh_ref[blk],
                       preferred_element_type=f32).sum(axis=0) + bproj_ref[blk]
        x = _ln(x + y, ln1_g_ref[blk], ln1_b_ref[blk])

        # MLP (Linear -> GELU -> Linear) + residual + LN2 fused.
        h = jnp.dot(x.astype(bf16), wfc1_ref[blk],
                    preferred_element_type=f32) + bfc1_ref[blk]
        h = _gelu_exact(h)
        h = jnp.dot(h.astype(bf16), wfc2_ref[blk],
                    preferred_element_type=f32) + bfc2_ref[blk]
        x = _ln(x + h, ln2_g_ref[blk], ln2_b_ref[blk])
        return x

    x = lax.fori_loop(0, n_block, block_body, x)
    rep_ref[0] = x.astype(rep_ref.dtype)

    # ---- value heads: Linear -> GELU -> LN, then the 1-wide projection as an
    #      elementwise multiply + lane reduction; results scattered into a
    #      lane-dense 128-wide padded output via host-provided one-hot rows ----
    v_pad = jnp.zeros((L, _VPAD), f32) + hb2_ref[...]               # bias pre-padded
    for i in range(n_obj):
        h = jnp.dot(x.astype(bf16), hw1_ref[i],
                    preferred_element_type=f32) + hb1_ref[i]
        h = _ln(_gelu_exact(h), hln_g_ref[i], hln_b_ref[i])
        vi = jnp.sum(h * hw2_ref[i], axis=-1, keepdims=True)        # (L, 1)
        v_pad = v_pad + vi * sel_ref[i]                             # (L,1)*(1,128)
    v_ref[0] = v_pad.astype(v_ref.dtype)


# --------------------------- parameters --------------------------------------

def build_params(key, state_dim, obs_dim, n_block, n_embd, n_objective):
    keys = iter(jax.random.split(key, 128))

    def lin(fi, fo, gain=1.0):
        # Deterministic synthetic init (stands in for orthogonal_ of the module).
        w = gain * jax.random.normal(next(keys), (fi, fo), jnp.float32) / math.sqrt(fi)
        return {"w": w, "b": jnp.zeros((fo,), jnp.float32)}

    def ln(d):
        return {"g": jnp.ones((d,), jnp.float32), "b": jnp.zeros((d,), jnp.float32)}

    params = {
        "state_enc": {"ln": ln(state_dim), "fc": lin(state_dim, n_embd)},
        "obs_enc": {"ln": ln(obs_dim), "fc": lin(obs_dim, n_embd)},
        "ln": ln(n_embd),
        "blocks": [],
        "heads": [],
    }
    for _ in range(n_block):
        params["blocks"].append({
            "ln1": ln(n_embd), "ln2": ln(n_embd),
            "key": lin(n_embd, n_embd), "query": lin(n_embd, n_embd),
            "value": lin(n_embd, n_embd), "proj": lin(n_embd, n_embd),
            "fc1": lin(n_embd, n_embd), "fc2": lin(n_embd, n_embd),
        })
    for _ in range(n_objective):
        params["heads"].append({
            "fc1": lin(n_embd, n_embd), "ln": ln(n_embd), "fc2": lin(n_embd, 1),
        })
    return params


# --------------------------- Encoder forward (single pallas_call) ------------

def encoder_forward(params, state, obs, n_head, encode_state=False):
    B, L, _ = obs.shape
    if encode_state:
        enc, xin = params["state_enc"], state
    else:
        enc, xin = params["obs_enc"], obs
    F_in = xin.shape[-1]
    D = params["ln"]["g"].shape[0]
    Dh = D // n_head
    n_block = len(params["blocks"])
    n_obj = len(params["heads"])
    bf16 = jnp.bfloat16
    r2 = lambda a: a.reshape(1, -1)

    def stack(get, dtype=jnp.float32):
        return jnp.stack([get(b) for b in params["blocks"]], axis=0).astype(dtype)

    # --- pack block weights (host-side, tiny); matmul weights pre-cast to bf16 ---
    ln1_g = stack(lambda b: r2(b["ln1"]["g"])); ln1_b = stack(lambda b: r2(b["ln1"]["b"]))
    ln2_g = stack(lambda b: r2(b["ln2"]["g"])); ln2_b = stack(lambda b: r2(b["ln2"]["b"]))
    wqkv = stack(lambda b: jnp.concatenate(
        [b["query"]["w"], b["key"]["w"], b["value"]["w"]], axis=1), bf16)      # (nb,D,3D)
    bqkv = stack(lambda b: jnp.concatenate(
        [b["query"]["b"], b["key"]["b"], b["value"]["b"]]).reshape(1, -1))     # (nb,1,3D)
    wprojh = stack(lambda b: b["proj"]["w"].reshape(n_head, Dh, D), bf16)      # (nb,H,Dh,D)
    bproj = stack(lambda b: r2(b["proj"]["b"]))
    wfc1 = stack(lambda b: b["fc1"]["w"], bf16); bfc1 = stack(lambda b: r2(b["fc1"]["b"]))
    wfc2 = stack(lambda b: b["fc2"]["w"], bf16); bfc2 = stack(lambda b: r2(b["fc2"]["b"]))

    # --- pack value-head weights; 1-wide fc2 becomes a row vector per head ---
    hw1 = jnp.stack([h["fc1"]["w"] for h in params["heads"]]).astype(bf16)     # (no,D,D)
    hb1 = jnp.stack([r2(h["fc1"]["b"]) for h in params["heads"]])
    hln_g = jnp.stack([r2(h["ln"]["g"]) for h in params["heads"]])
    hln_b = jnp.stack([r2(h["ln"]["b"]) for h in params["heads"]])
    hw2 = jnp.stack([h["fc2"]["w"].reshape(1, D) for h in params["heads"]])    # (no,1,D)
    hb2_pad = jnp.zeros((1, _VPAD), jnp.float32)
    sel = jnp.zeros((n_obj, 1, _VPAD), jnp.float32)
    for i, h in enumerate(params["heads"]):
        hb2_pad = hb2_pad.at[0, i].set(h["fc2"]["b"][0])
        sel = sel.at[i, 0, i].set(1.0)

    weights = (
        r2(enc["ln"]["g"]), r2(enc["ln"]["b"]),
        enc["fc"]["w"].astype(bf16), r2(enc["fc"]["b"]),
        r2(params["ln"]["g"]), r2(params["ln"]["b"]),
        ln1_g, ln1_b, ln2_g, ln2_b,
        wqkv, bqkv, wprojh, bproj, wfc1, bfc1, wfc2, bfc2,
        hw1, hb1, hln_g, hln_b, hw2, hb2_pad, sel)

    def pinned(a):  # full-array block, same (0,..) index every grid step -> VMEM resident
        nd = a.ndim
        return pl.BlockSpec(a.shape, lambda b, _n=nd: (0,) * _n)

    in_specs = ([pl.BlockSpec((1, L, F_in), lambda b: (b, 0, 0))]
                + [pinned(w) for w in weights])
    out_specs = (pl.BlockSpec((1, L, _VPAD), lambda b: (b, 0, 0)),
                 pl.BlockSpec((1, L, D), lambda b: (b, 0, 0)))
    out_shapes = (jax.ShapeDtypeStruct((B, L, _VPAD), jnp.float32),
                  jax.ShapeDtypeStruct((B, L, D), jnp.float32))

    flops = B * L * (2 * F_in * D
                     + n_block * (12 * D * D + 4 * D * L)
                     + n_obj * (2 * D * D + 2 * D))
    transcend = B * L * (D * (1 + n_block + n_obj) + n_block * n_head * L)
    bytes_accessed = (int(xin.size) * xin.dtype.itemsize
                      + sum(int(w.size) * w.dtype.itemsize for w in weights)
                      + B * L * (_VPAD + D) * 4)

    kernel = partial(_encoder_kernel, n_block=n_block, n_head=n_head,
                     n_obj=n_obj, L=L, D=D)

    v_pad, rep = pl.pallas_call(
        kernel,
        out_shape=out_shapes,
        grid_spec=pltpu.PrefetchScalarGridSpec(
            num_scalar_prefetch=0,
            grid=(B,),
            in_specs=in_specs,
            out_specs=out_specs),
        compiler_params=pltpu.CompilerParams(
            dimension_semantics=("parallel",),
            vmem_limit_bytes=64 * 1024 * 1024),
        cost_estimate=pl.CostEstimate(flops=flops, transcendentals=transcend,
                                      bytes_accessed=bytes_accessed),
    )(xin, *weights)

    return v_pad[:, :, :n_obj], rep


# --------------------------- pure-JAX reference -------------------------------

def _ln_ref(x, g, b):
    mu = x.mean(-1, keepdims=True)
    var = jnp.square(x - mu).mean(-1, keepdims=True)
    return (x - mu) / jnp.sqrt(var + _EPS) * g + b


def _lin_ref(x, p, act=None):
    y = x @ p["w"] + p["b"]
    return _gelu_exact(y) if act == "gelu" else y


def encoder_forward_ref(params, state, obs, n_head, encode_state=False):
    B, L, _ = obs.shape
    if encode_state:
        enc, xin = params["state_enc"], state
    else:
        enc, xin = params["obs_enc"], obs
    x = _gelu_exact(_lin_ref(_ln_ref(xin, enc["ln"]["g"], enc["ln"]["b"]), enc["fc"]))
    x = _ln_ref(x, params["ln"]["g"], params["ln"]["b"])
    D = x.shape[-1]
    Dh = D // n_head
    for blk in params["blocks"]:
        k = _lin_ref(x, blk["key"]).reshape(B, L, n_head, Dh).transpose(0, 2, 1, 3)
        q = _lin_ref(x, blk["query"]).reshape(B, L, n_head, Dh).transpose(0, 2, 1, 3)
        v = _lin_ref(x, blk["value"]).reshape(B, L, n_head, Dh).transpose(0, 2, 1, 3)
        att = jnp.einsum("bhqd,bhkd->bhqk", q, k) / math.sqrt(Dh)
        att = jax.nn.softmax(att, axis=-1)
        y = jnp.einsum("bhqk,bhkd->bhqd", att, v).transpose(0, 2, 1, 3).reshape(B, L, D)
        y = _lin_ref(y, blk["proj"])
        x = _ln_ref(x + y, blk["ln1"]["g"], blk["ln1"]["b"])
        h = _lin_ref(_lin_ref(x, blk["fc1"], act="gelu"), blk["fc2"])
        x = _ln_ref(x + h, blk["ln2"]["g"], blk["ln2"]["b"])
    rep = x
    v_locs = []
    for hd in params["heads"]:
        h = _lin_ref(rep, hd["fc1"], act="gelu")
        h = _ln_ref(h, hd["ln"]["g"], hd["ln"]["b"])
        v_locs.append(_lin_ref(h, hd["fc2"]))
    return jnp.concatenate(v_locs, axis=-1), rep


# --------------------------- main ---------------------------------------------

if __name__ == "__main__":
    B, n_agent = 2, 8
    state_dim, obs_dim = 24, 16
    n_block, n_embd, n_head, n_objective = 2, 32, 4, 2
    encode_state = False

    key = jax.random.PRNGKey(0)
    kp, ks, ko = jax.random.split(key, 3)
    params = build_params(kp, state_dim, obs_dim, n_block, n_embd, n_objective)
    state = jax.random.normal(ks, (B, n_agent, state_dim), jnp.float32)
    obs = jax.random.normal(ko, (B, n_agent, obs_dim), jnp.float32)

    v_locs, rep = encoder_forward(params, state, obs, n_head, encode_state)
    jax.block_until_ready((v_locs, rep))

    v_ref, rep_ref = encoder_forward_ref(params, state, obs, n_head, encode_state)
    assert v_locs.shape == (B, n_agent, n_objective)
    assert rep.shape == (B, n_agent, n_embd)
    # bf16 MXU operands (f32 accumulation) in the kernel -> relaxed tolerance
    # vs. the all-f32 reference (the review's correctness note anticipates this).
    assert jnp.allclose(v_locs, v_ref, atol=3e-2, rtol=3e-2)
    assert jnp.allclose(rep, rep_ref, atol=3e-2, rtol=3e-2)
    print("KERNEL_OK")
</pallas_src>

<mosaic_0001>
module attributes {stable_mosaic.version = 11 : i64} {
  func.func @_encoder_kernel(%arg0: i32, %arg1: memref<1x8x16xf32, #tpu.memory_space<vmem>>, %arg2: memref<1x16xf32, #tpu.memory_space<vmem>>, %arg3: memref<1x16xf32, #tpu.memory_space<vmem>>, %arg4: memref<16x32xbf16, #tpu.memory_space<vmem>>, %arg5: memref<1x32xf32, #tpu.memory_space<vmem>>, %arg6: memref<1x32xf32, #tpu.memory_space<vmem>>, %arg7: memref<1x32xf32, #tpu.memory_space<vmem>>, %arg8: memref<2x1x32xf32, #tpu.memory_space<vmem>>, %arg9: memref<2x1x32xf32, #tpu.memory_space<vmem>>, %arg10: memref<2x1x32xf32, #tpu.memory_space<vmem>>, %arg11: memref<2x1x32xf32, #tpu.memory_space<vmem>>, %arg12: memref<2x32x96xbf16, #tpu.memory_space<vmem>>, %arg13: memref<2x1x96xf32, #tpu.memory_space<vmem>>, %arg14: memref<2x4x8x32xbf16, #tpu.memory_space<vmem>>, %arg15: memref<2x1x32xf32, #tpu.memory_space<vmem>>, %arg16: memref<2x32x32xbf16, #tpu.memory_space<vmem>>, %arg17: memref<2x1x32xf32, #tpu.memory_space<vmem>>, %arg18: memref<2x32x32xbf16, #tpu.memory_space<vmem>>, %arg19: memref<2x1x32xf32, #tpu.memory_space<vmem>>, %arg20: memref<2x32x32xbf16, #tpu.memory_space<vmem>>, %arg21: memref<2x1x32xf32, #tpu.memory_space<vmem>>, %arg22: memref<2x1x32xf32, #tpu.memory_space<vmem>>, %arg23: memref<2x1x32xf32, #tpu.memory_space<vmem>>, %arg24: memref<2x1x32xf32, #tpu.memory_space<vmem>>, %arg25: memref<1x128xf32, #tpu.memory_space<vmem>>, %arg26: memref<2x1x128xf32, #tpu.memory_space<vmem>>, %arg27: memref<1x8x128xf32, #tpu.memory_space<vmem>>, %arg28: memref<1x8x32xf32, #tpu.memory_space<vmem>>) attributes {dimension_semantics = [#tpu.dimension_semantics<parallel>], iteration_bounds = array<i64: 2>, scalar_prefetch = 0 : i64, scratch_operands = 0 : i64, tpu.core_type = #tpu.core_type<tc>, window_params = [{transform_indices = @transform_0, window_bounds = array<i64: 1, 8, 16>}, {pipeline_mode = #tpu.pipeline_mode<synchronous>, transform_indices = @transform_1, window_bounds = array<i64: 1, 16>}, {pipeline_mode = #tpu.pipeline_mode<synchronous>, transform_indices = @transform_2, window_bounds = array<i64: 1, 16>}, {pipeline_mode = #tpu.pipeline_mode<synchronous>, transform_indices = @transform_3, window_bounds = array<i64: 16, 32>}, {pipeline_mode = #tpu.pipeline_mode<synchronous>, transform_indices = @transform_4, window_bounds = array<i64: 1, 32>}, {pipeline_mode = #tpu.pipeline_mode<synchronous>, transform_indices = @transform_5, window_bounds = array<i64: 1, 32>}, {pipeline_mode = #tpu.pipeline_mode<synchronous>, transform_indices = @transform_6, window_bounds = array<i64: 1, 32>}, {pipeline_mode = #tpu.pipeline_mode<synchronous>, transform_indices = @transform_7, window_bounds = array<i64: 2, 1, 32>}, {pipeline_mode = #tpu.pipeline_mode<synchronous>, transform_indices = @transform_8, window_bounds = array<i64: 2, 1, 32>}, {pipeline_mode = #tpu.pipeline_mode<synchronous>, transform_indices = @transform_9, window_bounds = array<i64: 2, 1, 32>}, {pipeline_mode = #tpu.pipeline_mode<synchronous>, transform_indices = @transform_10, window_bounds = array<i64: 2, 1, 32>}, {pipeline_mode = #tpu.pipeline_mode<synchronous>, transform_indices = @transform_11, window_bounds = array<i64: 2, 32, 96>}, {pipeline_mode = #tpu.pipeline_mode<synchronous>, transform_indices = @transform_12, window_bounds = array<i64: 2, 1, 96>}, {pipeline_mode = #tpu.pipeline_mode<synchronous>, transform_indices = @transform_13, window_bounds = array<i64: 2, 4, 8, 32>}, {pipeline_mode = #tpu.pipeline_mode<synchronous>, transform_indices = @transform_14, window_bounds = array<i64: 2, 1, 32>}, {pipeline_mode = #tpu.pipeline_mode<synchronous>, transform_indices = @transform_15, window_bounds = array<i64: 2, 32, 32>}, {pipeline_mode = #tpu.pipeline_mode<synchronous>, transform_indices = @transform_16, window_bounds = array<i64: 2, 1, 32>}, {pipeline_mode = #tpu.pipeline_mode<synchronous>, transform_indices = @transform_17, window_bounds = array<i64: 2, 32, 32>}, {pipeline_mode = #tpu.pipeline_mode<synchronous>, transform_indices = @transform_18, window_bounds = array<i64: 2, 1, 32>}, {pipeline_mode = #tpu.pipeline_mode<synchronous>, transform_indices = @transform_19, window_bounds = array<i64: 2, 32, 32>}, {pipeline_mode = #tpu.pipeline_mode<synchronous>, transform_indices = @transform_20, window_bounds = array<i64: 2, 1, 32>}, {pipeline_mode = #tpu.pipeline_mode<synchronous>, transform_indices = @transform_21, window_bounds = array<i64: 2, 1, 32>}, {pipeline_mode = #tpu.pipeline_mode<synchronous>, transform_indices = @transform_22, window_bounds = array<i64: 2, 1, 32>}, {pipeline_mode = #tpu.pipeline_mode<synchronous>, transform_indices = @transform_23, window_bounds = array<i64: 2, 1, 32>}, {pipeline_mode = #tpu.pipeline_mode<synchronous>, transform_indices = @transform_24, window_bounds = array<i64: 1, 128>}, {pipeline_mode = #tpu.pipeline_mode<synchronous>, transform_indices = @transform_25, window_bounds = array<i64: 2, 1, 128>}, {transform_indices = @transform_26, window_bounds = array<i64: 1, 8, 128>}, {transform_indices = @transform_27, window_bounds = array<i64: 1, 8, 32>}]} {
    %c0 = arith.constant 0 : index
    %c0_0 = arith.constant 0 : index
    %c0_1 = arith.constant 0 : index
    %0 = vector.load %arg1[%c0, %c0_0, %c0_1] : memref<1x8x16xf32, #tpu.memory_space<vmem>>, vector<1x8x16xf32>
    %1 = vector.shape_cast %0 : vector<1x8x16xf32> to vector<8x16xf32>
    %c0_2 = arith.constant 0 : index
    %c0_3 = arith.constant 0 : index
    %2 = vector.load %arg2[%c0_2, %c0_3] : memref<1x16xf32, #tpu.memory_space<vmem>>, vector<1x16xf32>
    %c0_4 = arith.constant 0 : index
    %c0_5 = arith.constant 0 : index
    %3 = vector.load %arg3[%c0_4, %c0_5] : memref<1x16xf32, #tpu.memory_space<vmem>>, vector<1x16xf32>
    %cst = arith.constant dense<0.000000e+00> : vector<8xf32>
    %4 = vector.multi_reduction <add>, %1, %cst [1] : vector<8x16xf32> to vector<8xf32>
    %5 = vector.shape_cast %4 : vector<8xf32> to vector<8x1xf32>
    %cst_6 = arith.constant 1.600000e+01 : f32
    %6 = vector.broadcast %cst_6 : f32 to vector<8x1xf32>
    %7 = arith.divf %5, %6 : vector<8x1xf32>
    %8 = vector.broadcast %7 : vector<8x1xf32> to vector<8x16xf32>
    %9 = arith.subf %1, %8 : vector<8x16xf32>
    %10 = arith.mulf %9, %9 : vector<8x16xf32>
    %cst_7 = arith.constant dense<0.000000e+00> : vector<8xf32>
    %11 = vector.multi_reduction <add>, %10, %cst_7 [1] : vector<8x16xf32> to vector<8xf32>
    %12 = vector.shape_cast %11 : vector<8xf32> to vector<8x1xf32>
    %cst_8 = arith.constant 1.600000e+01 : f32
    %13 = vector.broadcast %cst_8 : f32 to vector<8x1xf32>
    %14 = arith.divf %12, %13 : vector<8x1xf32>
    %15 = vector.broadcast %7 : vector<8x1xf32> to vector<8x16xf32>
    %16 = arith.subf %1, %15 : vector<8x16xf32>
    %cst_9 = arith.constant 9.99999974E-6 : f32
    %17 = vector.broadcast %cst_9 : f32 to vector<8x1xf32>
    %18 = arith.addf %14, %17 : vector<8x1xf32>
    %19 = math.rsqrt %18 : vector<8x1xf32>
    %20 = vector.broadcast %19 : vector<8x1xf32> to vector<8x16xf32>
    %21 = arith.mulf %16, %20 : vector<8x16xf32>
    %22 = vector.broadcast %2 : vector<1x16xf32> to vector<8x16xf32>
    %23 = arith.mulf %21, %22 : vector<8x16xf32>
    %24 = vector.broadcast %3 : vector<1x16xf32> to vector<8x16xf32>
    %25 = arith.addf %23, %24 : vector<8x16xf32>
    %26 = arith.truncf %25 : vector<8x16xf32> to vector<8x16xbf16>
    %c0_10 = arith.constant 0 : index
    %c0_11 = arith.constant 0 : index
    %27 = vector.load %arg4[%c0_10, %c0_11] : memref<16x32xbf16, #tpu.memory_space<vmem>>, vector<16x32xbf16>
    %cst_12 = arith.constant dense<0.000000e+00> : vector<8x32xf32>
    %28 = tpu.matmul %26, %27, %cst_12 {dimension_numbers = #tpu.dot_dimension_numbers<[1], [0], [0], [1], [0, 0, 1, 1], [], []>} : vector<8x16xbf16>, vector<16x32xbf16>, vector<8x32xf32> -> vector<8x32xf32>
    %c0_13 = arith.constant 0 : index
    %c0_14 = arith.constant 0 : index
    %29 = vector.load %arg5[%c0_13, %c0_14] : memref<1x32xf32, #tpu.memory_space<vmem>>, vector<1x32xf32>
    %30 = vector.broadcast %29 : vector<1x32xf32> to vector<8x32xf32>
    %31 = arith.addf %28, %30 : vector<8x32xf32>
    %cst_15 = arith.constant 5.000000e-01 : f32
    %32 = vector.broadcast %cst_15 : f32 to vector<8x32xf32>
    %33 = arith.mulf %32, %31 : vector<8x32xf32>
    %cst_16 = arith.constant 0.707106769 : f32
    %34 = vector.broadcast %cst_16 : f32 to vector<8x32xf32>
    %35 = arith.mulf %31, %34 : vector<8x32xf32>
    %36 = math.erf %35 : vector<8x32xf32>
    %cst_17 = arith.constant 1.000000e+00 : f32
    %37 = vector.broadcast %cst_17 : f32 to vector<8x32xf32>
    %38 = arith.addf %37, %36 : vector<8x32xf32>
    %39 = arith.mulf %33, %38 : vector<8x32xf32>
    %c0_18 = arith.constant 0 : index
    %c0_19 = arith.constant 0 : index
    %40 = vector.load %arg6[%c0_18, %c0_19] : memref<1x32xf32, #tpu.memory_space<vmem>>, vector<1x32xf32>
    %c0_20 = arith.constant 0 : index
    %c0_21 = arith.constant 0 : index
    %41 = vector.load %arg7[%c0_20, %c0_21] : memref<1x32xf32, #tpu.memory_space<vmem>>, vector<1x32xf32>
    %cst_22 = arith.constant dense<0.000000e+00> : vector<8xf32>
    %42 = vector.multi_reduction <add>, %39, %cst_22 [1] : vector<8x32xf32> to vector<8xf32>
    %43 = vector.shape_cast %42 : vector<8xf32> to vector<8x1xf32>
    %cst_23 = arith.constant 3.200000e+01 : f32
    %44 = vector.broadcast %cst_23 : f32 to vector<8x1xf32>
    %45 = arith.divf %43, %44 : vector<8x1xf32>
    %46 = vector.broadcast %45 : vector<8x1xf32> to vector<8x32xf32>
    %47 = arith.subf %39, %46 : vector<8x32xf32>
    %48 = arith.mulf %47, %47 : vector<8x32xf32>
    %cst_24 = arith.constant dense<0.000000e+00> : vector<8xf32>
    %49 = vector.multi_reduction <add>, %48, %cst_24 [1] : vector<8x32xf32> to vector<8xf32>
    %50 = vector.shape_cast %49 : vector<8xf32> to vector<8x1xf32>
    %cst_25 = arith.constant 3.200000e+01 : f32
    %51 = vector.broadcast %cst_25 : f32 to vector<8x1xf32>
    %52 = arith.divf %50, %51 : vector<8x1xf32>
    %53 = vector.broadcast %45 : vector<8x1xf32> to vector<8x32xf32>
    %54 = arith.subf %39, %53 : vector<8x32xf32>
    %cst_26 = arith.constant 9.99999974E-6 : f32
    %55 = vector.broadcast %cst_26 : f32 to vector<8x1xf32>
    %56 = arith.addf %52, %55 : vector<8x1xf32>
    %57 = math.rsqrt %56 : vector<8x1xf32>
    %58 = vector.broadcast %57 : vector<8x1xf32> to vector<8x32xf32>
    %59 = arith.mulf %54, %58 : vector<8x32xf32>
    %60 = vector.broadcast %40 : vector<1x32xf32> to vector<8x32xf32>
    %61 = arith.mulf %59, %60 : vector<8x32xf32>
    %62 = vector.broadcast %41 : vector<1x32xf32> to vector<8x32xf32>
    %63 = arith.addf %61, %62 : vector<8x32xf32>
    %c0_i32 = arith.constant 0 : i32
    %c2_i32 = arith.constant 2 : i32
    %64 = arith.addi %c0_i32, %c2_i32 : i32
    %c1_i32 = arith.constant 1 : i32
    %65 = scf.for %arg29 = %c0_i32 to %64 step %c1_i32 iter_args(%arg30 = %63) -> (vector<8x32xf32>)  : i32 {
      %184 = arith.truncf %arg30 : vector<8x32xf32> to vector<8x32xbf16>
      %185 = arith.index_cast %arg29 : i32 to index
      %c0_92 = arith.constant 0 : index
      %c0_93 = arith.constant 0 : index
      %186 = vector.load %arg12[%185, %c0_92, %c0_93] : memref<2x32x96xbf16, #tpu.memory_space<vmem>>, vector<1x32x96xbf16>
      %187 = vector.shape_cast %186 : vector<1x32x96xbf16> to vector<32x96xbf16>
      %cst_94 = arith.constant dense<0.000000e+00> : vector<8x96xf32>
      %188 = tpu.matmul %184, %187, %cst_94 {dimension_numbers = #tpu.dot_dimension_numbers<[1], [0], [0], [1], [0, 0, 1, 1], [], []>} : vector<8x32xbf16>, vector<32x96xbf16>, vector<8x96xf32> -> vector<8x96xf32>
      %189 = arith.index_cast %arg29 : i32 to index
      %c0_95 = arith.constant 0 : index
      %c0_96 = arith.constant 0 : index
      %190 = vector.load %arg13[%189, %c0_95, %c0_96] : memref<2x1x96xf32, #tpu.memory_space<vmem>>, vector<1x1x96xf32>
      %191 = vector.shape_cast %190 : vector<1x1x96xf32> to vector<1x96xf32>
      %192 = vector.broadcast %191 : vector<1x96xf32> to vector<8x96xf32>
      %193 = arith.addf %188, %192 : vector<8x96xf32>
      %194 = vector.extract_strided_slice %193 {offsets = [0, 0], sizes = [8, 8], strides = [1, 1]} : vector<8x96xf32> to vector<8x8xf32>
      %195 = vector.extract_strided_slice %193 {offsets = [0, 8], sizes = [8, 8], strides = [1, 1]} : vector<8x96xf32> to vector<8x8xf32>
      %196 = vector.extract_strided_slice %193 {offsets = [0, 16], sizes = [8, 8], strides = [1, 1]} : vector<8x96xf32> to vector<8x8xf32>
      %197 = vector.extract_strided_slice %193 {offsets = [0, 24], sizes = [8, 8], strides = [1, 1]} : vector<8x96xf32> to vector<8x8xf32>
      %198 = vector.shape_cast %194 : vector<8x8xf32> to vector<1x8x8xf32>
      %199 = vector.shape_cast %195 : vector<8x8xf32> to vector<1x8x8xf32>
      %200 = vector.shape_cast %196 : vector<8x8xf32> to vector<1x8x8xf32>
      %201 = vector.shape_cast %197 : vector<8x8xf32> to vector<1x8x8xf32>
      %202 = tpu.concatenate %198, %199, %200, %201 in 0 : vector<1x8x8xf32>, vector<1x8x8xf32>, vector<1x8x8xf32>, vector<1x8x8xf32> -> vector<4x8x8xf32>
      %cst_97 = arith.constant 0.353553385 : f32
      %203 = vector.broadcast %cst_97 : f32 to vector<4x8x8xf32>
      %204 = arith.mulf %202, %203 : vector<4x8x8xf32>
      %205 = vector.extract_strided_slice %193 {offsets = [0, 32], sizes = [8, 8], strides = [1, 1]} : vector<8x96xf32> to vector<8x8xf32>
      %206 = vector.extract_strided_slice %193 {offsets = [0, 40], sizes = [8, 8], strides = [1, 1]} : vector<8x96xf32> to vector<8x8xf32>
      %207 = vector.extract_strided_slice %193 {offsets = [0, 48], sizes = [8, 8], strides = [1, 1]} : vector<8x96xf32> to vector<8x8xf32>
      %208 = vector.extract_strided_slice %193 {offsets = [0, 56], sizes = [8, 8], strides = [1, 1]} : vector<8x96xf32> to vector<8x8xf32>
      %209 = vector.shape_cast %205 : vector<8x8xf32> to vector<1x8x8xf32>
      %210 = vector.shape_cast %206 : vector<8x8xf32> to vector<1x8x8xf32>
      %211 = vector.shape_cast %207 : vector<8x8xf32> to vector<1x8x8xf32>
      %212 = vector.shape_cast %208 : vector<8x8xf32> to vector<1x8x8xf32>
      %213 = tpu.concatenate %209, %210, %211, %212 in 0 : vector<1x8x8xf32>, vector<1x8x8xf32>, vector<1x8x8xf32>, vector<1x8x8xf32> -> vector<4x8x8xf32>
      %214 = vector.extract_strided_slice %193 {offsets = [0, 64], sizes = [8, 8], strides = [1, 1]} : vector<8x96xf32> to vector<8x8xf32>
      %215 = vector.extract_strided_slice %193 {offsets = [0, 72], sizes = [8, 8], strides = [1, 1]} : vector<8x96xf32> to vector<8x8xf32>
      %216 = vector.extract_strided_slice %193 {offsets = [0, 80], sizes = [8, 8], strides = [1, 1]} : vector<8x96xf32> to vector<8x8xf32>
      %217 = vector.extract_strided_slice %193 {offsets = [0, 88], sizes = [8, 8], strides = [1, 1]} : vector<8x96xf32> to vector<8x8xf32>
      %218 = vector.shape_cast %214 : vector<8x8xf32> to vector<1x8x8xf32>
      %219 = vector.shape_cast %215 : vector<8x8xf32> to vector<1x8x8xf32>
      %220 = vector.shape_cast %216 : vector<8x8xf32> to vector<1x8x8xf32>
      %221 = vector.shape_cast %217 : vector<8x8xf32> to vector<1x8x8xf32>
      %222 = tpu.concatenate %218, %219, %220, %221 in 0 : vector<1x8x8xf32>, vector<1x8x8xf32>, vector<1x8x8xf32>, vector<1x8x8xf32> -> vector<4x8x8xf32>
      "tpu.trace_start"() <{level = 10 : i32, message = "hqd,hkd->hqk"}> : () -> ()
      %cst_98 = arith.constant dense<0.000000e+00> : vector<4x8x8xf32>
      %223 = tpu.matmul %204, %213, %cst_98 {dimension_numbers = #tpu.dot_dimension_numbers<[2], [2], [1], [1], [0, 0, 0, 1, 1, 1], [0], [0]>} : vector<4x8x8xf32>, vector<4x8x8xf32>, vector<4x8x8xf32> -> vector<4x8x8xf32>
      "tpu.trace_stop"() : () -> ()
      %cst_99 = arith.constant dense<0xFF800000> : vector<4x8xf32>
      %224 = vector.multi_reduction <maximumf>, %223, %cst_99 [2] : vector<4x8x8xf32> to vector<4x8xf32>
      %225 = vector.shape_cast %224 : vector<4x8xf32> to vector<4x8x1xf32>
      %226 = vector.broadcast %225 : vector<4x8x1xf32> to vector<4x8x8xf32>
      %227 = arith.subf %223, %226 : vector<4x8x8xf32>
      %228 = math.exp %227 : vector<4x8x8xf32>
      %cst_100 = arith.constant dense<0.000000e+00> : vector<4x8xf32>
      %229 = vector.multi_reduction <add>, %228, %cst_100 [2] : vector<4x8x8xf32> to vector<4x8xf32>
      %230 = vector.shape_cast %229 : vector<4x8xf32> to vector<4x8x1xf32>
      %231 = tpu.reciprocal %230 : vector<4x8x1xf32> -> vector<4x8x1xf32>
      %232 = vector.broadcast %231 : vector<4x8x1xf32> to vector<4x8x8xf32>
      %233 = arith.mulf %228, %232 : vector<4x8x8xf32>
      "tpu.trace_start"() <{level = 10 : i32, message = "hqk,hkd->hqd"}> : () -> ()
      %cst_101 = arith.constant dense<0.000000e+00> : vector<4x8x8xf32>
      %234 = tpu.matmul %233, %222, %cst_101 {dimension_numbers = #tpu.dot_dimension_numbers<[2], [1], [1], [2], [0, 0, 0, 1, 1, 2], [0], [0]>} : vector<4x8x8xf32>, vector<4x8x8xf32>, vector<4x8x8xf32> -> vector<4x8x8xf32>
      "tpu.trace_stop"() : () -> ()
      %235 = arith.truncf %234 : vector<4x8x8xf32> to vector<4x8x8xbf16>
      %236 = arith.index_cast %arg29 : i32 to index
      %c0_102 = arith.constant 0 : index
      %c0_103 = arith.constant 0 : index
      %c0_104 = arith.constant 0 : index
      %237 = vector.load %arg14[%236, %c0_102, %c0_103, %c0_104] : memref<2x4x8x32xbf16, #tpu.memory_space<vmem>>, vector<1x4x8x32xbf16>
      %238 = vector.shape_cast %237 : vector<1x4x8x32xbf16> to vector<4x8x32xbf16>
      "tpu.trace_start"() <{level = 10 : i32, message = "hld,hdo->hlo"}> : () -> ()
      %cst_105 = arith.constant dense<0.000000e+00> : vector<4x8x32xf32>
      %239 = tpu.matmul %235, %238, %cst_105 {dimension_numbers = #tpu.dot_dimension_numbers<[2], [1], [1], [2], [0, 0, 0, 1, 1, 2], [0], [0]>} : vector<4x8x8xbf16>, vector<4x8x32xbf16>, vector<4x8x32xf32> -> vector<4x8x32xf32>
      "tpu.trace_stop"() : () -> ()
      %cst_106 = arith.constant dense<0.000000e+00> : vector<8x32xf32>
      %240 = vector.multi_reduction <add>, %239, %cst_106 [0] : vector<4x8x32xf32> to vector<8x32xf32>
      %241 = arith.index_cast %arg29 : i32 to index
      %c0_107 = arith.constant 0 : index
      %c0_108 = arith.constant 0 : index
      %242 = vector.load %arg15[%241, %c0_107, %c0_108] : memref<2x1x32xf32, #tpu.memory_space<vmem>>, vector<1x1x32xf32>
      %243 = vector.shape_cast %242 : vector<1x1x32xf32> to vector<1x32xf32>
      %244 = vector.broadcast %243 : vector<1x32xf32> to vector<8x32xf32>
      %245 = arith.addf %240, %244 : vector<8x32xf32>
      %246 = arith.addf %arg30, %245 : vector<8x32xf32>
      %247 = arith.index_cast %arg29 : i32 to index
      %c0_109 = arith.constant 0 : index
      %c0_110 = arith.constant 0 : index
      %248 = vector.load %arg8[%247, %c0_109, %c0_110] : memref<2x1x32xf32, #tpu.memory_space<vmem>>, vector<1x1x32xf32>
      %249 = vector.shape_cast %248 : vector<1x1x32xf32> to vector<1x32xf32>
      %250 = arith.index_cast %arg29 : i32 to index
      %c0_111 = arith.constant 0 : index
      %c0_112 = arith.constant 0 : index
      %251 = vector.load %arg9[%250, %c0_111, %c0_112] : memref<2x1x32xf32, #tpu.memory_space<vmem>>, vector<1x1x32xf32>
      %252 = vector.shape_cast %251 : vector<1x1x32xf32> to vector<1x32xf32>
      %cst_113 = arith.constant dense<0.000000e+00> : vector<8xf32>
      %253 = vector.multi_reduction <add>, %246, %cst_113 [1] : vector<8x32xf32> to vector<8xf32>
      %254 = vector.shape_cast %253 : vector<8xf32> to vector<8x1xf32>
      %cst_114 = arith.constant 3.200000e+01 : f32
      %255 = vector.broadcast %cst_114 : f32 to vector<8x1xf32>
      %256 = arith.divf %254, %255 : vector<8x1xf32>
      %257 = vector.broadcast %256 : vector<8x1xf32> to vector<8x32xf32>
      %258 = arith.subf %246, %257 : vector<8x32xf32>
      %259 = arith.mulf %258, %258 : vector<8x32xf32>
      %cst_115 = arith.constant dense<0.000000e+00> : vector<8xf32>
      %260 = vector.multi_reduction <add>, %259, %cst_115 [1] : vector<8x32xf32> to vector<8xf32>
      %261 = vector.shape_cast %260 : vector<8xf32> to vector<8x1xf32>
      %cst_116 = arith.constant 3.200000e+01 : f32
      %262 = vector.broadcast %cst_116 : f32 to vector<8x1xf32>
      %263 = arith.divf %261, %262 : vector<8x1xf32>
      %264 = vector.broadcast %256 : vector<8x1xf32> to vector<8x32xf32>
      %265 = arith.subf %246, %264 : vector<8x32xf32>
      %cst_117 = arith.constant 9.99999974E-6 : f32
      %266 = vector.broadcast %cst_117 : f32 to vector<8x1xf32>
      %267 = arith.addf %263, %266 : vector<8x1xf32>
      %268 = math.rsqrt %267 : vector<8x1xf32>
      %269 = vector.broadcast %268 : vector<8x1xf32> to vector<8x32xf32>
      %270 = arith.mulf %265, %269 : vector<8x32xf32>
      %271 = vector.broadcast %249 : vector<1x32xf32> to vector<8x32xf32>
      %272 = arith.mulf %270, %271 : vector<8x32xf32>
      %273 = vector.broadcast %252 : vector<1x32xf32> to vector<8x32xf32>
      %274 = arith.addf %272, %273 : vector<8x32xf32>
      %275 = arith.truncf %274 : vector<8x32xf32> to vector<8x32xbf16>
      %276 = arith.index_cast %arg29 : i32 to index
      %c0_118 = arith.constant 0 : index
      %c0_119 = arith.constant 0 : index
      %277 = vector.load %arg16[%276, %c0_118, %c0_119] : memref<2x32x32xbf16, #tpu.memory_space<vmem>>, vector<1x32x32xbf16>
      %278 = vector.shape_cast %277 : vector<1x32x32xbf16> to vector<32x32xbf16>
      %cst_120 = arith.constant dense<0.000000e+00> : vector<8x32xf32>
      %279 = tpu.matmul %275, %278, %cst_120 {dimension_numbers = #tpu.dot_dimension_numbers<[1], [0], [0], [1], [0, 0, 1, 1], [], []>} : vector<8x32xbf16>, vector<32x32xbf16>, vector<8x32xf32> -> vector<8x32xf32>
      %280 = arith.index_cast %arg29 : i32 to index
      %c0_121 = arith.constant 0 : index
      %c0_122 = arith.constant 0 : index
      %281 = vector.load %arg17[%280, %c0_121, %c0_122] : memref<2x1x32xf32, #tpu.memory_space<vmem>>, vector<1x1x32xf32>
      %282 = vector.shape_cast %281 : vector<1x1x32xf32> to vector<1x32xf32>
      %283 = vector.broadcast %282 : vector<1x32xf32> to vector<8x32xf32>
      %284 = arith.addf %279, %283 : vector<8x32xf32>
      %cst_123 = arith.constant 5.000000e-01 : f32
      %285 = vector.broadcast %cst_123 : f32 to vector<8x32xf32>
      %286 = arith.mulf %285, %284 : vector<8x32xf32>
      %cst_124 = arith.constant 0.707106769 : f32
      %287 = vector.broadcast %cst_124 : f32 to vector<8x32xf32>
      %288 = arith.mulf %284, %287 : vector<8x32xf32>
      %289 = math.erf %288 : vector<8x32xf32>
      %cst_125 = arith.constant 1.000000e+00 : f32
      %290 = vector.broadcast %cst_125 : f32 to vector<8x32xf32>
      %291 = arith.addf %290, %289 : vector<8x32xf32>
      %292 = arith.mulf %286, %291 : vector<8x32xf32>
      %293 = arith.truncf %292 : vector<8x32xf32> to vector<8x32xbf16>
      %294 = arith.index_cast %arg29 : i32 to index
      %c0_126 = arith.constant 0 : index
      %c0_127 = arith.constant 0 : index
      %295 = vector.load %arg18[%294, %c0_126, %c0_127] : memref<2x32x32xbf16, #tpu.memory_space<vmem>>, vector<1x32x32xbf16>
      %296 = vector.shape_cast %295 : vector<1x32x32xbf16> to vector<32x32xbf16>
      %cst_128 = arith.constant dense<0.000000e+00> : vector<8x32xf32>
      %297 = tpu.matmul %293, %296, %cst_128 {dimension_numbers = #tpu.dot_dimension_numbers<[1], [0], [0], [1], [0, 0, 1, 1], [], []>} : vector<8x32xbf16>, vector<32x32xbf16>, vector<8x32xf32> -> vector<8x32xf32>
      %298 = arith.index_cast %arg29 : i32 to index
      %c0_129 = arith.constant 0 : index
      %c0_130 = arith.constant 0 : index
      %299 = vector.load %arg19[%298, %c0_129, %c0_130] : memref<2x1x32xf32, #tpu.memory_space<vmem>>, vector<1x1x32xf32>
      %300 = vector.shape_cast %299 : vector<1x1x32xf32> to vector<1x32xf32>
      %301 = vector.broadcast %300 : vector<1x32xf32> to vector<8x32xf32>
      %302 = arith.addf %297, %301 : vector<8x32xf32>
      %303 = arith.addf %274, %302 : vector<8x32xf32>
      %304 = arith.index_cast %arg29 : i32 to index
      %c0_131 = arith.constant 0 : index
      %c0_132 = arith.constant 0 : index
      %305 = vector.load %arg10[%304, %c0_131, %c0_132] : memref<2x1x32xf32, #tpu.memory_space<vmem>>, vector<1x1x32xf32>
      %306 = vector.shape_cast %305 : vector<1x1x32xf32> to vector<1x32xf32>
      %307 = arith.index_cast %arg29 : i32 to index
      %c0_133 = arith.constant 0 : index
      %c0_134 = arith.constant 0 : index
      %308 = vector.load %arg11[%307, %c0_133, %c0_134] : memref<2x1x32xf32, #tpu.memory_space<vmem>>, vector<1x1x32xf32>
      %309 = vector.shape_cast %308 : vector<1x1x32xf32> to vector<1x32xf32>
      %cst_135 = arith.constant dense<0.000000e+00> : vector<8xf32>
      %310 = vector.multi_reduction <add>, %303, %cst_135 [1] : vector<8x32xf32> to vector<8xf32>
      %311 = vector.shape_cast %310 : vector<8xf32> to vector<8x1xf32>
      %cst_136 = arith.constant 3.200000e+01 : f32
      %312 = vector.broadcast %cst_136 : f32 to vector<8x1xf32>
      %313 = arith.divf %311, %312 : vector<8x1xf32>
      %314 = vector.broadcast %313 : vector<8x1xf32> to vector<8x32xf32>
      %315 = arith.subf %303, %314 : vector<8x32xf32>
      %316 = arith.mulf %315, %315 : vector<8x32xf32>
      %cst_137 = arith.constant dense<0.000000e+00> : vector<8xf32>
      %317 = vector.multi_reduction <add>, %316, %cst_137 [1] : vector<8x32xf32> to vector<8xf32>
      %318 = vector.shape_cast %317 : vector<8xf32> to vector<8x1xf32>
      %cst_138 = arith.constant 3.200000e+01 : f32
      %319 = vector.broadcast %cst_138 : f32 to vector<8x1xf32>
      %320 = arith.divf %318, %319 : vector<8x1xf32>
      %321 = vector.broadcast %313 : vector<8x1xf32> to vector<8x32xf32>
      %322 = arith.subf %303, %321 : vector<8x32xf32>
      %cst_139 = arith.constant 9.99999974E-6 : f32
      %323 = vector.broadcast %cst_139 : f32 to vector<8x1xf32>
      %324 = arith.addf %320, %323 : vector<8x1xf32>
      %325 = math.rsqrt %324 : vector<8x1xf32>
      %326 = vector.broadcast %325 : vector<8x1xf32> to vector<8x32xf32>
      %327 = arith.mulf %322, %326 : vector<8x32xf32>
      %328 = vector.broadcast %306 : vector<1x32xf32> to vector<8x32xf32>
      %329 = arith.mulf %327, %328 : vector<8x32xf32>
      %330 = vector.broadcast %309 : vector<1x32xf32> to vector<8x32xf32>
      %331 = arith.addf %329, %330 : vector<8x32xf32>
      scf.yield %331 : vector<8x32xf32>
    }
    %c2_i32_27 = arith.constant 2 : i32
    %c0_28 = arith.constant 0 : index
    %c0_29 = arith.constant 0 : index
    %c0_30 = arith.constant 0 : index
    %66 = vector.load %arg28[%c0_28, %c0_29, %c0_30] : memref<1x8x32xf32, #tpu.memory_space<vmem>>, vector<1x8x32xf32>
    %67 = vector.shape_cast %66 : vector<1x8x32xf32> to vector<8x32xf32>
    %68 = vector.shape_cast %65 : vector<8x32xf32> to vector<1x8x32xf32>
    tpu.vector_store %arg28[%c0_28, %c0_29, %c0_30], %68 {strides = array<i32>} : memref<1x8x32xf32, #tpu.memory_space<vmem>>, vector<1x8x32xf32>,
    %cst_31 = arith.constant 0.000000e+00 : f32
    %69 = vector.broadcast %cst_31 : f32 to vector<8x128xf32>
    %c0_32 = arith.constant 0 : index
    %c0_33 = arith.constant 0 : index
    %70 = vector.load %arg25[%c0_32, %c0_33] : memref<1x128xf32, #tpu.memory_space<vmem>>, vector<1x128xf32>
    %71 = vector.broadcast %70 : vector<1x128xf32> to vector<8x128xf32>
    %72 = arith.addf %69, %71 : vector<8x128xf32>
    %73 = arith.truncf %65 : vector<8x32xf32> to vector<8x32xbf16>
    %c0_34 = arith.constant 0 : index
    %c0_35 = arith.constant 0 : index
    %c0_36 = arith.constant 0 : index
    %74 = vector.load %arg20[%c0_34, %c0_35, %c0_36] : memref<2x32x32xbf16, #tpu.memory_space<vmem>>, vector<1x32x32xbf16>
    %75 = vector.shape_cast %74 : vector<1x32x32xbf16> to vector<32x32xbf16>
    %cst_37 = arith.constant dense<0.000000e+00> : vector<8x32xf32>
    %76 = tpu.matmul %73, %75, %cst_37 {dimension_numbers = #tpu.dot_dimension_numbers<[1], [0], [0], [1], [0, 0, 1, 1], [], []>} : vector<8x32xbf16>, vector<32x32xbf16>, vector<8x32xf32> -> vector<8x32xf32>
    %c0_38 = arith.constant 0 : index
    %c0_39 = arith.constant 0 : index
    %c0_40 = arith.constant 0 : index
    %77 = vector.load %arg21[%c0_38, %c0_39, %c0_40] : memref<2x1x32xf32, #tpu.memory_space<vmem>>, vector<1x1x32xf32>
    %78 = vector.shape_cast %77 : vector<1x1x32xf32> to vector<1x32xf32>
    %79 = vector.broadcast %78 : vector<1x32xf32> to vector<8x32xf32>
    %80 = arith.addf %76, %79 : vector<8x32xf32>
    %cst_41 = arith.constant 5.000000e-01 : f32
    %81 = vector.broadcast %cst_41 : f32 to vector<8x32xf32>
    %82 = arith.mulf %81, %80 : vector<8x32xf32>
    %cst_42 = arith.constant 0.707106769 : f32
    %83 = vector.broadcast %cst_42 : f32 to vector<8x32xf32>
    %84 = arith.mulf %80, %83 : vector<8x32xf32>
    %85 = math.erf %84 : vector<8x32xf32>
    %cst_43 = arith.constant 1.000000e+00 : f32
    %86 = vector.broadcast %cst_43 : f32 to vector<8x32xf32>
    %87 = arith.addf %86, %85 : vector<8x32xf32>
    %88 = arith.mulf %82, %87 : vector<8x32xf32>
    %c0_44 = arith.constant 0 : index
    %c0_45 = arith.constant 0 : index
    %c0_46 = arith.constant 0 : index
    %89 = vector.load %arg22[%c0_44, %c0_45, %c0_46] : memref<2x1x32xf32, #tpu.memory_space<vmem>>, vector<1x1x32xf32>
    %90 = vector.shape_cast %89 : vector<1x1x32xf32> to vector<1x32xf32>
    %c0_47 = arith.constant 0 : index
    %c0_48 = arith.constant 0 : index
    %c0_49 = arith.constant 0 : index
    %91 = vector.load %arg23[%c0_47, %c0_48, %c0_49] : memref<2x1x32xf32, #tpu.memory_space<vmem>>, vector<1x1x32xf32>
    %92 = vector.shape_cast %91 : vector<1x1x32xf32> to vector<1x32xf32>
    %cst_50 = arith.constant dense<0.000000e+00> : vector<8xf32>
    %93 = vector.multi_reduction <add>, %88, %cst_50 [1] : vector<8x32xf32> to vector<8xf32>
    %94 = vector.shape_cast %93 : vector<8xf32> to vector<8x1xf32>
    %cst_51 = arith.constant 3.200000e+01 : f32
    %95 = vector.broadcast %cst_51 : f32 to vector<8x1xf32>
    %96 = arith.divf %94, %95 : vector<8x1xf32>
    %97 = vector.broadcast %96 : vector<8x1xf32> to vector<8x32xf32>
    %98 = arith.subf %88, %97 : vector<8x32xf32>
    %99 = arith.mulf %98, %98 : vector<8x32xf32>
    %cst_52 = arith.constant dense<0.000000e+00> : vector<8xf32>
    %100 = vector.multi_reduction <add>, %99, %cst_52 [1] : vector<8x32xf32> to vector<8xf32>
    %101 = vector.shape_cast %100 : vector<8xf32> to vector<8x1xf32>
    %cst_53 = arith.constant 3.200000e+01 : f32
    %102 = vector.broadcast %cst_53 : f32 to vector<8x1xf32>
    %103 = arith.divf %101, %102 : vector<8x1xf32>
    %104 = vector.broadcast %96 : vector<8x1xf32> to vector<8x32xf32>
    %105 = arith.subf %88, %104 : vector<8x32xf32>
    %cst_54 = arith.constant 9.99999974E-6 : f32
    %106 = vector.broadcast %cst_54 : f32 to vector<8x1xf32>
    %107 = arith.addf %103, %106 : vector<8x1xf32>
    %108 = math.rsqrt %107 : vector<8x1xf32>
    %109 = vector.broadcast %108 : vector<8x1xf32> to vector<8x32xf32>
    %110 = arith.mulf %105, %109 : vector<8x32xf32>
    %111 = vector.broadcast %90 : vector<1x32xf32> to vector<8x32xf32>
    %112 = arith.mulf %110, %111 : vector<8x32xf32>
    %113 = vector.broadcast %92 : vector<1x32xf32> to vector<8x32xf32>
    %114 = arith.addf %112, %113 : vector<8x32xf32>
    %c0_55 = arith.constant 0 : index
    %c0_56 = arith.constant 0 : index
    %c0_57 = arith.constant 0 : index
    %115 = vector.load %arg24[%c0_55, %c0_56, %c0_57] : memref<2x1x32xf32, #tpu.memory_space<vmem>>, vector<1x1x32xf32>
    %116 = vector.shape_cast %115 : vector<1x1x32xf32> to vector<1x32xf32>
    %117 = vector.broadcast %116 : vector<1x32xf32> to vector<8x32xf32>
    %118 = arith.mulf %114, %117 : vector<8x32xf32>
    %cst_58 = arith.constant dense<0.000000e+00> : vector<8xf32>
    %119 = vector.multi_reduction <add>, %118, %cst_58 [1] : vector<8x32xf32> to vector<8xf32>
    %120 = vector.shape_cast %119 : vector<8xf32> to vector<8x1xf32>
    %c0_59 = arith.constant 0 : index
    %c0_60 = arith.constant 0 : index
    %c0_61 = arith.constant 0 : index
    %121 = vector.load %arg26[%c0_59, %c0_60, %c0_61] : memref<2x1x128xf32, #tpu.memory_space<vmem>>, vector<1x1x128xf32>
    %122 = vector.shape_cast %121 : vector<1x1x128xf32> to vector<1x128xf32>
    %123 = vector.broadcast %120 : vector<8x1xf32> to vector<8x128xf32>
    %124 = vector.broadcast %122 : vector<1x128xf32> to vector<8x128xf32>
    %125 = arith.mulf %123, %124 : vector<8x128xf32>
    %126 = arith.addf %72, %125 : vector<8x128xf32>
    %127 = arith.truncf %65 : vector<8x32xf32> to vector<8x32xbf16>
    %c1 = arith.constant 1 : index
    %c0_62 = arith.constant 0 : index
    %c0_63 = arith.constant 0 : index
    %128 = vector.load %arg20[%c1, %c0_62, %c0_63] : memref<2x32x32xbf16, #tpu.memory_space<vmem>>, vector<1x32x32xbf16>
    %129 = vector.shape_cast %128 : vector<1x32x32xbf16> to vector<32x32xbf16>
    %cst_64 = arith.constant dense<0.000000e+00> : vector<8x32xf32>
    %130 = tpu.matmul %127, %129, %cst_64 {dimension_numbers = #tpu.dot_dimension_numbers<[1], [0], [0], [1], [0, 0, 1, 1], [], []>} : vector<8x32xbf16>, vector<32x32xbf16>, vector<8x32xf32> -> vector<8x32xf32>
    %c1_65 = arith.constant 1 : index
    %c0_66 = arith.constant 0 : index
    %c0_67 = arith.constant 0 : index
    %131 = vector.load %arg21[%c1_65, %c0_66, %c0_67] : memref<2x1x32xf32, #tpu.memory_space<vmem>>, vector<1x1x32xf32>
    %132 = vector.shape_cast %131 : vector<1x1x32xf32> to vector<1x32xf32>
    %133 = vector.broadcast %132 : vector<1x32xf32> to vector<8x32xf32>
    %134 = arith.addf %130, %133 : vector<8x32xf32>
    %cst_68 = arith.constant 5.000000e-01 : f32
    %135 = vector.broadcast %cst_68 : f32 to vector<8x32xf32>
    %136 = arith.mulf %135, %134 : vector<8x32xf32>
    %cst_69 = arith.constant 0.707106769 : f32
    %137 = vector.broadcast %cst_69 : f32 to vector<8x32xf32>
    %138 = arith.mulf %134, %137 : vector<8x32xf32>
    %139 = math.erf %138 : vector<8x32xf32>
    %cst_70 = arith.constant 1.000000e+00 : f32
    %140 = vector.broadcast %cst_70 : f32 to vector<8x32xf32>
    %141 = arith.addf %140, %139 : vector<8x32xf32>
    %142 = arith.mulf %136, %141 : vector<8x32xf32>
    %c1_71 = arith.constant 1 : index
    %c0_72 = arith.constant 0 : index
    %c0_73 = arith.constant 0 : index
    %143 = vector.load %arg22[%c1_71, %c0_72, %c0_73] : memref<2x1x32xf32, #tpu.memory_space<vmem>>, vector<1x1x32xf32>
    %144 = vector.shape_cast %143 : vector<1x1x32xf32> to vector<1x32xf32>
    %c1_74 = arith.constant 1 : index
    %c0_75 = arith.constant 0 : index
    %c0_76 = arith.constant 0 : index
    %145 = vector.load %arg23[%c1_74, %c0_75, %c0_76] : memref<2x1x32xf32, #tpu.memory_space<vmem>>, vector<1x1x32xf32>
    %146 = vector.shape_cast %145 : vector<1x1x32xf32> to vector<1x32xf32>
    %cst_77 = arith.constant dense<0.000000e+00> : vector<8xf32>
    %147 = vector.multi_reduction <add>, %142, %cst_77 [1] : vector<8x32xf32> to vector<8xf32>
    %148 = vector.shape_cast %147 : vector<8xf32> to vector<8x1xf32>
    %cst_78 = arith.constant 3.200000e+01 : f32
    %149 = vector.broadcast %cst_78 : f32 to vector<8x1xf32>
    %150 = arith.divf %148, %149 : vector<8x1xf32>
    %151 = vector.broadcast %150 : vector<8x1xf32> to vector<8x32xf32>
    %152 = arith.subf %142, %151 : vector<8x32xf32>
    %153 = arith.mulf %152, %152 : vector<8x32xf32>
    %cst_79 = arith.constant dense<0.000000e+00> : vector<8xf32>
    %154 = vector.multi_reduction <add>, %153, %cst_79 [1] : vector<8x32xf32> to vector<8xf32>
    %155 = vector.shape_cast %154 : vector<8xf32> to vector<8x1xf32>
    %cst_80 = arith.constant 3.200000e+01 : f32
    %156 = vector.broadcast %cst_80 : f32 to vector<8x1xf32>
    %157 = arith.divf %155, %156 : vector<8x1xf32>
    %158 = vector.broadcast %150 : vector<8x1xf32> to vector<8x32xf32>
    %159 = arith.subf %142, %158 : vector<8x32xf32>
    %cst_81 = arith.constant 9.99999974E-6 : f32
    %160 = vector.broadcast %cst_81 : f32 to vector<8x1xf32>
    %161 = arith.addf %157, %160 : vector<8x1xf32>
    %162 = math.rsqrt %161 : vector<8x1xf32>
    %163 = vector.broadcast %162 : vector<8x1xf32> to vector<8x32xf32>
    %164 = arith.mulf %159, %163 : vector<8x32xf32>
    %165 = vector.broadcast %144 : vector<1x32xf32> to vector<8x32xf32>
    %166 = arith.mulf %164, %165 : vector<8x32xf32>
    %167 = vector.broadcast %146 : vector<1x32xf32> to vector<8x32xf32>
    %168 = arith.addf %166, %167 : vector<8x32xf32>
    %c1_82 = arith.constant 1 : index
    %c0_83 = arith.constant 0 : index
    %c0_84 = arith.constant 0 : index
    %169 = vector.load %arg24[%c1_82, %c0_83, %c0_84] : memref<2x1x32xf32, #tpu.memory_space<vmem>>, vector<1x1x32xf32>
    %170 = vector.shape_cast %169 : vector<1x1x32xf32> to vector<1x32xf32>
    %171 = vector.broadcast %170 : vector<1x32xf32> to vector<8x32xf32>
    %172 = arith.mulf %168, %171 : vector<8x32xf32>
    %cst_85 = arith.constant dense<0.000000e+00> : vector<8xf32>
    %173 = vector.multi_reduction <add>, %172, %cst_85 [1] : vector<8x32xf32> to vector<8xf32>
    %174 = vector.shape_cast %173 : vector<8xf32> to vector<8x1xf32>
    %c1_86 = arith.constant 1 : index
    %c0_87 = arith.constant 0 : index
    %c0_88 = arith.constant 0 : index
    %175 = vector.load %arg26[%c1_86, %c0_87, %c0_88] : memref<2x1x128xf32, #tpu.memory_space<vmem>>, vector<1x1x128xf32>
    %176 = vector.shape_cast %175 : vector<1x1x128xf32> to vector<1x128xf32>
    %177 = vector.broadcast %174 : vector<8x1xf32> to vector<8x128xf32>
    %178 = vector.broadcast %176 : vector<1x128xf32> to vector<8x128xf32>
    %179 = arith.mulf %177, %178 : vector<8x128xf32>
    %180 = arith.addf %126, %179 : vector<8x128xf32>
    %c0_89 = arith.constant 0 : index
    %c0_90 = arith.constant 0 : index
    %c0_91 = arith.constant 0 : index
    %181 = vector.load %arg27[%c0_89, %c0_90, %c0_91] : memref<1x8x128xf32, #tpu.memory_space<vmem>>, vector<1x8x128xf32>
    %182 = vector.shape_cast %181 : vector<1x8x128xf32> to vector<8x128xf32>
    %183 = vector.shape_cast %180 : vector<8x128xf32> to vector<1x8x128xf32>
    tpu.vector_store %arg27[%c0_89, %c0_90, %c0_91], %183 {strides = array<i32>} : memref<1x8x128xf32, #tpu.memory_space<vmem>>, vector<1x8x128xf32>,
    return
  }
  func.func @transform_0(%arg0: i32) -> (i32, i32, i32) {
    %c0_i32 = arith.constant 0 : i32
    %c0_i32_0 = arith.constant 0 : i32
    %c0_i32_1 = arith.constant 0 : i32
    return %arg0, %c0_i32, %c0_i32_0 : i32, i32, i32
  }
  func.func @transform_1(%arg0: i32) -> (i32, i32) {
    %c0_i32 = arith.constant 0 : i32
    %c0_i32_0 = arith.constant 0 : i32
    %c0_i32_1 = arith.constant 0 : i32
    return %c0_i32, %c0_i32_0 : i32, i32
  }
  func.func @transform_2(%arg0: i32) -> (i32, i32) {
    %c0_i32 = arith.constant 0 : i32
    %c0_i32_0 = arith.constant 0 : i32
    %c0_i32_1 = arith.constant 0 : i32
    return %c0_i32, %c0_i32_0 : i32, i32
  }
  func.func @transform_3(%arg0: i32) -> (i32, i32) {
    %c0_i32 = arith.constant 0 : i32
    %c0_i32_0 = arith.constant 0 : i32
    %c0_i32_1 = arith.constant 0 : i32
    return %c0_i32, %c0_i32_0 : i32, i32
  }
  func.func @transform_4(%arg0: i32) -> (i32, i32) {
    %c0_i32 = arith.constant 0 : i32
    %c0_i32_0 = arith.constant 0 : i32
    %c0_i32_1 = arith.constant 0 : i32
    return %c0_i32, %c0_i32_0 : i32, i32
  }
  func.func @transform_5(%arg0: i32) -> (i32, i32) {
    %c0_i32 = arith.constant 0 : i32
    %c0_i32_0 = arith.constant 0 : i32
    %c0_i32_1 = arith.constant 0 : i32
    return %c0_i32, %c0_i32_0 : i32, i32
  }
  func.func @transform_6(%arg0: i32) -> (i32, i32) {
    %c0_i32 = arith.constant 0 : i32
    %c0_i32_0 = arith.constant 0 : i32
    %c0_i32_1 = arith.constant 0 : i32
    return %c0_i32, %c0_i32_0 : i32, i32
  }
  func.func @transform_7(%arg0: i32) -> (i32, i32, i32) {
    %c0_i32 = arith.constant 0 : i32
    %c0_i32_0 = arith.constant 0 : i32
    %c0_i32_1 = arith.constant 0 : i32
    %c0_i32_2 = arith.constant 0 : i32
    return %c0_i32, %c0_i32_0, %c0_i32_1 : i32, i32, i32
  }
  func.func @transform_8(%arg0: i32) -> (i32, i32, i32) {
    %c0_i32 = arith.constant 0 : i32
    %c0_i32_0 = arith.constant 0 : i32
    %c0_i32_1 = arith.constant 0 : i32
    %c0_i32_2 = arith.constant 0 : i32
    return %c0_i32, %c0_i32_0, %c0_i32_1 : i32, i32, i32
  }
  func.func @transform_9(%arg0: i32) -> (i32, i32, i32) {
    %c0_i32 = arith.constant 0 : i32
    %c0_i32_0 = arith.constant 0 : i32
    %c0_i32_1 = arith.constant 0 : i32
    %c0_i32_2 = arith.constant 0 : i32
    return %c0_i32, %c0_i32_0, %c0_i32_1 : i32, i32, i32
  }
  func.func @transform_10(%arg0: i32) -> (i32, i32, i32) {
    %c0_i32 = arith.constant 0 : i32
    %c0_i32_0 = arith.constant 0 : i32
    %c0_i32_1 = arith.constant 0 : i32
    %c0_i32_2 = arith.constant 0 : i32
    return %c0_i32, %c0_i32_0, %c0_i32_1 : i32, i32, i32
  }
  func.func @transform_11(%arg0: i32) -> (i32, i32, i32) {
    %c0_i32 = arith.constant 0 : i32
    %c0_i32_0 = arith.constant 0 : i32
    %c0_i32_1 = arith.constant 0 : i32
    %c0_i32_2 = arith.constant 0 : i32
    return %c0_i32, %c0_i32_0, %c0_i32_1 : i32, i32, i32
  }
  func.func @transform_12(%arg0: i32) -> (i32, i32, i32) {
    %c0_i32 = arith.constant 0 : i32
    %c0_i32_0 = arith.constant 0 : i32
    %c0_i32_1 = arith.constant 0 : i32
    %c0_i32_2 = arith.constant 0 : i32
    return %c0_i32, %c0_i32_0, %c0_i32_1 : i32, i32, i32
  }
  func.func @transform_13(%arg0: i32) -> (i32, i32, i32, i32) {
    %c0_i32 = arith.constant 0 : i32
    %c0_i32_0 = arith.constant 0 : i32
    %c0_i32_1 = arith.constant 0 : i32
    %c0_i32_2 = arith.constant 0 : i32
    %c0_i32_3 = arith.constant 0 : i32
    return %c0_i32, %c0_i32_0, %c0_i32_1, %c0_i32_2 : i32, i32, i32, i32
  }
  func.func @transform_14(%arg0: i32) -> (i32, i32, i32) {
    %c0_i32 = arith.constant 0 : i32
    %c0_i32_0 = arith.constant 0 : i32
    %c0_i32_1 = arith.constant 0 : i32
    %c0_i32_2 = arith.constant 0 : i32
    return %c0_i32, %c0_i32_0, %c0_i32_1 : i32, i32, i32
  }
  func.func @transform_15(%arg0: i32) -> (i32, i32, i32) {
    %c0_i32 = arith.constant 0 : i32
    %c0_i32_0 = arith.constant 0 : i32
    %c0_i32_1 = arith.constant 0 : i32
    %c0_i32_2 = arith.constant 0 : i32
    return %c0_i32, %c0_i32_0, %c0_i32_1 : i32, i32, i32
  }
  func.func @transform_16(%arg0: i32) -> (i32, i32, i32) {
    %c0_i32 = arith.constant 0 : i32
    %c0_i32_0 = arith.constant 0 : i32
    %c0_i32_1 = arith.constant 0 : i32
    %c0_i32_2 = arith.constant 0 : i32
    return %c0_i32, %c0_i32_0, %c0_i32_1 : i32, i32, i32
  }
  func.func @transform_17(%arg0: i32) -> (i32, i32, i32) {
    %c0_i32 = arith.constant 0 : i32
    %c0_i32_0 = arith.constant 0 : i32
    %c0_i32_1 = arith.constant 0 : i32
    %c0_i32_2 = arith.constant 0 : i32
    return %c0_i32, %c0_i32_0, %c0_i32_1 : i32, i32, i32
  }
  func.func @transform_18(%arg0: i32) -> (i32, i32, i32) {
    %c0_i32 = arith.constant 0 : i32
    %c0_i32_0 = arith.constant 0 : i32
    %c0_i32_1 = arith.constant 0 : i32
    %c0_i32_2 = arith.constant 0 : i32
    return %c0_i32, %c0_i32_0, %c0_i32_1 : i32, i32, i32
  }
  func.func @transform_19(%arg0: i32) -> (i32, i32, i32) {
    %c0_i32 = arith.constant 0 : i32
    %c0_i32_0 = arith.constant 0 : i32
    %c0_i32_1 = arith.constant 0 : i32
    %c0_i32_2 = arith.constant 0 : i32
    return %c0_i32, %c0_i32_0, %c0_i32_1 : i32, i32, i32
  }
  func.func @transform_20(%arg0: i32) -> (i32, i32, i32) {
    %c0_i32 = arith.constant 0 : i32
    %c0_i32_0 = arith.constant 0 : i32
    %c0_i32_1 = arith.constant 0 : i32
    %c0_i32_2 = arith.constant 0 : i32
    return %c0_i32, %c0_i32_0, %c0_i32_1 : i32, i32, i32
  }
  func.func @transform_21(%arg0: i32) -> (i32, i32, i32) {
    %c0_i32 = arith.constant 0 : i32
    %c0_i32_0 = arith.constant 0 : i32
    %c0_i32_1 = arith.constant 0 : i32
    %c0_i32_2 = arith.constant 0 : i32
    return %c0_i32, %c0_i32_0, %c0_i32_1 : i32, i32, i32
  }
  func.func @transform_22(%arg0: i32) -> (i32, i32, i32) {
    %c0_i32 = arith.constant 0 : i32
    %c0_i32_0 = arith.constant 0 : i32
    %c0_i32_1 = arith.constant 0 : i32
    %c0_i32_2 = arith.constant 0 : i32
    return %c0_i32, %c0_i32_0, %c0_i32_1 : i32, i32, i32
  }
  func.func @transform_23(%arg0: i32) -> (i32, i32, i32) {
    %c0_i32 = arith.constant 0 : i32
    %c0_i32_0 = arith.constant 0 : i32
    %c0_i32_1 = arith.constant 0 : i32
    %c0_i32_2 = arith.constant 0 : i32
    return %c0_i32, %c0_i32_0, %c0_i32_1 : i32, i32, i32
  }
  func.func @transform_24(%arg0: i32) -> (i32, i32) {
    %c0_i32 = arith.constant 0 : i32
    %c0_i32_0 = arith.constant 0 : i32
    %c0_i32_1 = arith.constant 0 : i32
    return %c0_i32, %c0_i32_0 : i32, i32
  }
  func.func @transform_25(%arg0: i32) -> (i32, i32, i32) {
    %c0_i32 = arith.constant 0 : i32
    %c0_i32_0 = arith.constant 0 : i32
    %c0_i32_1 = arith.constant 0 : i32
    %c0_i32_2 = arith.constant 0 : i32
    return %c0_i32, %c0_i32_0, %c0_i32_1 : i32, i32, i32
  }
  func.func @transform_26(%arg0: i32) -> (i32, i32, i32) {
    %c0_i32 = arith.constant 0 : i32
    %c0_i32_0 = arith.constant 0 : i32
    %c0_i32_1 = arith.constant 0 : i32
    return %arg0, %c0_i32, %c0_i32_0 : i32, i32, i32
  }
  func.func @transform_27(%arg0: i32) -> (i32, i32, i32) {
    %c0_i32 = arith.constant 0 : i32
    %c0_i32_0 = arith.constant 0 : i32
    %c0_i32_1 = arith.constant 0 : i32
    return %arg0, %c0_i32, %c0_i32_0 : i32, i32, i32
  }
}

</mosaic_0001>

<bundles_post_ra>
// kernel: tpu_custom_call.1
= control target key start
LH: loop header
LB: loop body
LE: loop exit
PB: predicated region body
PF: predicated region fallthrough
CT: control target
= control target key end

     0   :  { %s4918_s0 = inlined_call_operand.hbm [shape: f32[2,8,16], index: 0, kind: input, shape index: {}]   ;;  %s4919_s1 = inlined_call_operand.hbm [shape: f32[1,16], index: 1, kind: input, shape index: {}]   ;;  %s4920_s2 = inlined_call_operand.hbm [shape: f32[1,16], index: 2, kind: input, shape index: {}]   ;;  %s4921_s3 = inlined_call_operand.hbm [shape: bf16[16,32], index: 3, kind: input, shape index: {}]   ;;  %s4922_s4 = inlined_call_operand.hbm [shape: f32[1,32], index: 4, kind: input, shape index: {}]   ;;  %s4923_s5 = inlined_call_operand.hbm [shape: f32[1,32], index: 5, kind: input, shape index: {}]   ;;  %s4924_s6 = inlined_call_operand.hbm [shape: f32[1,32], index: 6, kind: input, shape index: {}]   ;;  %s4925_s7 = inlined_call_operand.vmem [shape: f32[2,1,32], index: 7, kind: input, shape index: {}]   ;;  %s4926_s8 = inlined_call_operand.hbm [shape: f32[2,1,32], index: 8, kind: input, shape index: {}]   ;;  %s4927_s9 = inlined_call_operand.hbm [shape: f32[2,1,32], index: 9, kind: input, shape index: {}]   ;;  %s4928_s10 = inlined_call_operand.hbm [shape: f32[2,1,32], index: 10, kind: input, shape index: {}]   ;;  %s4929_s11 = inlined_call_operand.hbm [shape: bf16[2,32,96], index: 11, kind: input, shape index: {}]   ;;  %s4930_s12 = inlined_call_operand.hbm [shape: f32[2,1,96], index: 12, kind: input, shape index: {}]   ;;  %s4931_s13 = inlined_call_operand.hbm [shape: bf16[2,4,8,32], index: 13, kind: input, shape index: {}]   ;;  %s4932_s14 = inlined_call_operand.hbm [shape: f32[2,1,32], index: 14, kind: input, shape index: {}]   ;;  %s4933_s15 = inlined_call_operand.hbm [shape: bf16[2,32,32], index: 15, kind: input, shape index: {}]   ;;  %s4934_s16 = inlined_call_operand.hbm [shape: f32[2,1,32], index: 16, kind: input, shape index: {}]   ;;  %s4935_s17 = inlined_call_operand.hbm [shape: bf16[2,32,32], index: 17, kind: input, shape index: {}]   ;;  %s4936_s18 = inlined_call_operand.hbm [shape: f32[2,1,32], index: 18, kind: input, shape index: {}]   ;;  %s4937_s19 = inlined_call_operand.vmem [shape: bf16[2,32,32], index: 19, kind: input, shape index: {}]   ;;  %s4938_s20 = inlined_call_operand.vmem [shape: f32[2,1,32], index: 20, kind: input, shape index: {}]   ;;  %s4939_s21 = inlined_call_operand.vmem [shape: f32[2,1,32], index: 21, kind: input, shape index: {}]   ;;  %s4940_s22 = inlined_call_operand.vmem [shape: f32[2,1,32], index: 22, kind: input, shape index: {}]   ;;  %s4941_s23 = inlined_call_operand.vmem [shape: f32[2,1,32], index: 23, kind: input, shape index: {}]   ;;  %s4942_s24 = inlined_call_operand.vmem [shape: f32[1,128], index: 24, kind: input, shape index: {}]   ;;  %s4943_s25 = inlined_call_operand.vmem [shape: f32[2,1,128], index: 25, kind: input, shape index: {}]   ;;  %s4944_s26 = inlined_call_operand.hbm [shape: f32[2,8,128], index: 26, kind: output, shape index: {0}]   ;;  %s4945_s27 = inlined_call_operand.hbm [shape: f32[2,8,32], index: 27, kind: output, shape index: {1}]  }
   0x1   :  { %4963 = sst [smem:[#allocation46_spill]] %s4918_s0 }
   0x2   :  { %4964 = sst [smem:[#allocation47_spill]] %s4919_s1 }
   0x3   :  { %4965 = sst [smem:[#allocation48_spill]] %s4920_s2 }
   0x4   :  { %4966 = sst [smem:[#allocation49_spill]] %s4921_s3 }
   0x5   :  { %4967 = sst [smem:[#allocation50_spill]] %s4922_s4 }
   0x6   :  { %4968 = sst [smem:[#allocation51_spill]] %s4923_s5 }
   0x7   :  { %4969 = sst [smem:[#allocation52_spill]] %s4924_s6 }
   0x8   :  { %4970 = sst [smem:[#allocation53_spill]] %s4925_s7 }
   0x9   :  { %4971 = sst [smem:[#allocation54_spill]] %s4926_s8 }
   0xa   :  { %4972 = sst [smem:[#allocation55_spill]] %s4927_s9 }
   0xb   :  { %4973 = sst [smem:[#allocation56_spill]] %s4928_s10 }
   0xc   :  { %4974 = sst [smem:[#allocation57_spill]] %s4929_s11 }
   0xd   :  { %4975 = sst [smem:[#allocation58_spill]] %s4930_s12 }
   0xe   :  { %4976 = sst [smem:[#allocation59_spill]] %s4931_s13 }
   0xf   :  { %4977 = sst [smem:[#allocation60_spill]] %s4932_s14 }
  0x10   :  { %4978 = sst [smem:[#allocation61_spill]] %s4933_s15 }
  0x11   :  { %4979 = sst [smem:[#allocation62_spill]] %s4934_s16 }
  0x12   :  { %4980 = sst [smem:[#allocation63_spill]] %s4935_s17 }
  0x13   :  { %4981 = sst [smem:[#allocation64_spill]] %s4936_s18 }
  0x14   :  { %4982 = sst [smem:[#allocation65_spill]] %s4941_s23 }
  0x15   :  { %4983 = sst [smem:[#allocation66_spill]] %s4942_s24 }
  0x16   :  { %4984 = sst [smem:[#allocation67_spill]] %s4943_s25 }
  0x17   :  { %4985 = sst [smem:[#allocation68_spill]] %s4944_s26 }
  0x18   :  { %4986 = sst [smem:[#allocation69_spill]] %s4945_s27 }
  0x19   :  { %33 = vsyncpa [#allocation3], 0 }
  0x1a   :  { %35 = vsyncpa [#allocation3 + $0x1], 0 }
  0x1b   :  { %36 = vsyncpa [#allocation6], 0 }
  0x1c   :  { %37 = vsyncpa [#allocation9], 0 }
  0x1d   :  { %38 = vsyncpa [#allocation12], 0 }
  0x1e   :  { %39 = vsyncpa [#allocation15], 0 }
  0x1f   :  { %40 = vsyncpa [#allocation18], 0 }
  0x20   :  { %41 = vsyncpa [#allocation21], 0 }
  0x21   :  { %42 = vsyncpa [#allocation24], 0 }
  0x22   :  { %43 = vsyncpa [#allocation27], 0 }
  0x23   :  { %44 = vsyncpa [#allocation30], 0 }
  0x24   :  { %45 = vsyncpa [#allocation4], 0 }
  0x25   :  { %47 = vsyncpa [#allocation4 + $0x1], 0 }
  0x26   :  { %48 = vsyncpa [#allocation33], 0 }
  0x27   :  { %50 = vsyncpa [#allocation33 + $0x1], 0  ;;  %s4317_s7 = smov 0   ;;  %s4319_s4 = smov 0  }
  0x28   :  { %s4321_s8 = smov 0   ;;  %s4323_s30 = smov 0  }
  0x29 LB: > { %s4144_s9 = smov [#allocation5]   ;;  %s4338_s28 = sadd.s32 4294967295, %s4134_s30   ;;  %s4134_s30 = sphi %s4323_s30, %s5052_s30   ;;  %s4130_s8 = sphi %s4321_s8, %s5051_s8   ;;  %s4126_s4 = sphi %s4319_s4, %s5050_s4   ;;  %s4122_s7 = sphi %s4317_s7, %s5049_s7  }
  0x2a   : > { %s677_s5 = sshll.u32 %s4144_s9, 4  ;;  %p2954_p0 = scmp.ge.s32.totalorder %s4134_s30, 1  ;;  %s678_s5 = int_to_ptr.vmem [resolvable:$true] %s677_s5 }
  0x2b   : > { %p4953_p1 = scmp.eq.s32.totalorder %s4338_s28, 0  ;;  %p664_p2 = scmp.lt.s32.totalorder %s4134_s30, 3 }
  0x2c   : > { %s4145_s10 = smov [#allocation8]   ;;  %s4146_s6 = smov [#allocation11]  }
  0x2d   : > { %p4343_p3 = pnand %p2954_p0, %p664_p2  ;;  %s698_s29 = sshll.u32 %s4145_s10, 4  ;;  %s4350_s29 = int_to_ptr.vmem [resolvable:$true] %s698_s29 }
  0x2e   : > { %s723_s11 = sshll.u32 %s4146_s6, 4  ;;  %s3537_s3 = scalar_lea.vmem %s678_s5, 16  ;;  %s4358_s11 = int_to_ptr.vmem [resolvable:$true] %s723_s11 }
  0x2f   : > { %s4987_s0 = scalar_select %p4343_p3, 1, 0 }
  0x30   : > { %p3302_p5 = pneg %p4343_p3  ;;  %p3538_p8 = scmp.ne.s32.totalorder %s678_s5, %s3537_s3 }
  0x31   : > { %s3544_s9 = scalar_lea.vmem %s678_s5, 32  ;;  %p3545_p11 = scmp.lt.s32.totalorder %s678_s5, %s678_s5 }
  0x32   : > { %p4354_p6 = pnand %p3302_p5, %p4953_p1  ;;  %p3546_p12 = scmp.lt.s32.totalorder %s3544_s9, %s3537_s3 }
  0x34   : > { %p4362_p7 = pneg %p4354_p6  ;;  %p3547_p13 = por %p3546_p12, %p3545_p11 }
  0x36   : > { %p3540_p9 = pnand %p3538_p8, %p4362_p7 }
  0x38   : > { %p3541_p10 = pneg %p3540_p9 }
  0x3a   : > { %p3548_p0 = pnand %p3547_p13, %p3541_p10 }
  0x3c   : > { %3551 = shalt.err (!%p3548_p0)
}
  0x3d   : > { %s4990_s26 = sld [smem:[#allocation47_spill]]  ;;  %s3563_s24 = scalar_lea.vmem %s4350_s29, 128 }
  0x3e   : > { %p3564_p2 = scmp.ne.s32.totalorder %s4350_s29, %s3563_s24  ;;  %p3571_p9 = scmp.lt.s32.totalorder %s4350_s29, %s4350_s29 }
  0x3f   : > { %p3572_p11 = scmp.lt.s32.totalorder %s3563_s24, %s3563_s24 }
  0x40   : > { %p3566_p5 = pnand %p3564_p2, %p4362_p7 }
  0x41   : > { %p3573_p10 = por %p3572_p11, %p3571_p9 }
  0x42   : > { %p3567_p8 = pneg %p3566_p5 }
  0x43   : > { %3305 = dma.hbm_to_vmem [thread:$0]  (!%p4354_p6), %s4990_s26, 16, %s678_s5, [#allocation6]  }
  0x44   : > { %p3574_p12 = pnand %p3573_p10, %p3567_p8 }
  0x46   : > { %3577 = shalt.err (!%p3574_p12)
}
  0x47   : > { %s4951_s3 = smov 64   ;;  %s4955_s26 = smov 4  }
  0x48   : > { %s4991_s10 = sld [smem:[#allocation49_spill]]  ;;  %s3589_s24 = scalar_lea.vmem %s4358_s11, 16 }
  0x49   : > { %p3590_p13 = scmp.ne.s32.totalorder %s4358_s11, %s3589_s24  ;;  %s3596_s6 = scalar_lea.vmem %s4358_s11, 32 }
  0x4a   : > { %p3597_p5 = scmp.lt.s32.totalorder %s4358_s11, %s4358_s11  ;;  %p3598_p8 = scmp.lt.s32.totalorder %s3596_s6, %s3589_s24 }
  0x4b   : > { %p3592_p0 = pnand %p3590_p13, %p4362_p7 }
  0x4c   : > { %p3599_p9 = por %p3598_p8, %p3597_p5 }
  0x4d   : > { %p3593_p2 = pneg %p3592_p0 }
  0x4e   : > { %3311 = dma.hbm_to_vmem [thread:$0]  (!%p4354_p6), %s4991_s10, 128, %s4350_s29, [#allocation9], %s4951_s3, %s4951_s3, %s4955_s26  }
  0x4f   : > { %p3600_p11 = pnand %p3599_p9, %p3593_p2 }
  0x51   : > { %3603 = shalt.err (!%p3600_p11)
}
  0x52   : > { %s4992_s23 = sld [smem:[#allocation51_spill]]  ;;  %s4149_s29 = smov [#allocation14]  }
  0x53   : > { %s747_s5 = sshll.u32 %s4149_s29, 4  ;;  %s748_s5 = int_to_ptr.vmem [resolvable:$true] %s747_s5 }
  0x54   : > { %s3615_s9 = scalar_lea.vmem %s748_s5, 32  ;;  %p3623_p0 = scmp.lt.s32.totalorder %s748_s5, %s748_s5 }
  0x55   : > { %p3616_p10 = scmp.ne.s32.totalorder %s748_s5, %s3615_s9  ;;  %p3624_p5 = scmp.lt.s32.totalorder %s3615_s9, %s3615_s9 }
  0x57   : > { %p3618_p12 = pnand %p3616_p10, %p4362_p7  ;;  %p3625_p2 = por %p3624_p5, %p3623_p0 }
  0x58   : > { %3317 = dma.hbm_to_vmem [thread:$0]  (!%p4354_p6), %s4992_s23, 16, %s4358_s11, [#allocation12]  }
  0x59   : > { %p3619_p13 = pneg %p3618_p12 }
  0x5b   : > { %p3626_p8 = pnand %p3625_p2, %p3619_p13 }
  0x5d   : > { %3629 = shalt.err (!%p3626_p8)
}
  0x5e   : > { %s4957_s10 = smov 16   ;;  %s4151_s24 = smov 1  }
  0x5f   : > { %s4993_s27 = sld [smem:[#allocation54_spill]]  ;;  %s4152_s11 = smov [#allocation17]  }
  0x60   : > { %s773_s6 = sshll.u32 %s4152_s11, 4  ;;  %s4153_s29 = smov [#allocation20]   ;;  %s774_s6 = int_to_ptr.vmem [resolvable:$true] %s773_s6 }
  0x61   : > { %s799_s3 = sshll.u32 %s4153_s29, 4  ;;  %s3641_s9 = scalar_lea.vmem %s774_s6, 32  ;;  %s800_s3 = int_to_ptr.vmem [resolvable:$true] %s799_s3 }
  0x62   : > { %p3642_p9 = scmp.ne.s32.totalorder %s774_s6, %s3641_s9  ;;  %p3649_p12 = scmp.lt.s32.totalorder %s774_s6, %s774_s6 }
  0x63   : > { %p3650_p13 = scmp.lt.s32.totalorder %s3641_s9, %s3641_s9 }
  0x64   : > { %p3644_p11 = pnand %p3642_p9, %p4362_p7 }
  0x65   : > { %3323 = dma.hbm_to_vmem [thread:$0]  (!%p4354_p6), %s4993_s27, 32, %s748_s5, [#allocation15], %s4957_s10, %s4957_s10, %s4151_s24  }
  0x66   : > { %p3645_p10 = pneg %p3644_p11  ;;  %p3651_p0 = por %p3650_p13, %p3649_p12 }
  0x68   : > { %p3652_p5 = pnand %p3651_p0, %p3645_p10 }
  0x6a   : > { %3655 = shalt.err (!%p3652_p5)
}
  0x6b   : > { %s4994_s25 = sld [smem:[#allocation56_spill]]  ;;  %s3667_s27 = scalar_lea.vmem %s800_s3, 32 }
  0x6c   : > { %p3668_p2 = scmp.ne.s32.totalorder %s800_s3, %s3667_s27  ;;  %p3675_p11 = scmp.lt.s32.totalorder %s800_s3, %s800_s3 }
  0x6d   : > { %p3676_p4 = scmp.lt.s32.totalorder %s3667_s27, %s3667_s27 }
  0x6e   : > { %p3670_p8 = pnand %p3668_p2, %p4362_p7 }
  0x6f   : > { %p3677_p12 = por %p3676_p4, %p3675_p11 }
  0x70   : > { %p3671_p9 = pneg %p3670_p8 }
  0x71   : > { %3329 = dma.hbm_to_vmem [thread:$0]  (!%p4354_p6), %s4994_s25, 32, %s774_s6, [#allocation18], %s4957_s10, %s4957_s10, %s4151_s24  }
  0x72   : > { %p3678_p10 = pnand %p3677_p12, %p3671_p9 }
  0x74   : > { %3681 = shalt.err (!%p3678_p10)
}
  0x75   : > { %s4995_s12 = sld [smem:[#allocation58_spill]]  ;;  %s4154_s6 = smov [#allocation23]  }
  0x76   : > { %s825_s9 = sshll.u32 %s4154_s6, 4  ;;  %s4155_s5 = smov [#allocation26]   ;;  %s826_s9 = int_to_ptr.vmem [resolvable:$true] %s825_s9 }
  0x77   : > { %s851_s23 = sshll.u32 %s4155_s5, 4  ;;  %s3693_s25 = scalar_lea.vmem %s826_s9, 32  ;;  %s852_s23 = int_to_ptr.vmem [resolvable:$true] %s851_s23 }
  0x78   : > { %p3694_p4 = scmp.ne.s32.totalorder %s826_s9, %s3693_s25  ;;  %p3701_p5 = scmp.lt.s32.totalorder %s826_s9, %s826_s9 }
  0x79   : > { %p3702_p2 = scmp.lt.s32.totalorder %s3693_s25, %s3693_s25 }
  0x7a   : > { %p3696_p13 = pnand %p3694_p4, %p4362_p7 }
  0x7b   : > { %3335 = dma.hbm_to_vmem [thread:$0]  (!%p4354_p6), %s4995_s12, 32, %s800_s3, [#allocation21], %s4957_s10, %s4957_s10, %s4151_s24  }
  0x7c   : > { %p3697_p0 = pneg %p3696_p13  ;;  %p3703_p8 = por %p3702_p2, %p3701_p5 }
  0x7e   : > { %p3704_p9 = pnand %p3703_p8, %p3697_p0 }
  0x80   : > { %3707 = shalt.err (!%p3704_p9)
}
  0x81   : > { %s4996_s14 = sld [smem:[#allocation60_spill]]  ;;  %s3719_s11 = scalar_lea.vmem %s852_s23, 32 }
  0x82   : > { %p3720_p11 = scmp.ne.s32.totalorder %s852_s23, %s3719_s11  ;;  %p3727_p4 = scmp.lt.s32.totalorder %s852_s23, %s852_s23 }
  0x83   : > { %p3728_p13 = scmp.lt.s32.totalorder %s3719_s11, %s3719_s11 }
  0x84   : > { %p3722_p12 = pnand %p3720_p11, %p4362_p7 }
  0x85   : > { %p3729_p5 = por %p3728_p13, %p3727_p4 }
  0x86   : > { %p3723_p10 = pneg %p3722_p12 }
  0x87   : > { %3341 = dma.hbm_to_vmem [thread:$0]  (!%p4354_p6), %s4996_s14, 32, %s826_s9, [#allocation24], %s4957_s10, %s4957_s10, %s4151_s24  }
  0x88   : > { %p3730_p0 = pnand %p3729_p5, %p3723_p10 }
  0x8a   : > { %3733 = shalt.err (!%p3730_p0)
}
  0x8b   : > { %s4997_s16 = sld [smem:[#allocation62_spill]]  ;;  %s4156_s9 = smov [#allocation7]  }
  0x8c   : > { %s688_s5 = sshll.u32 %s4156_s9, 4  ;;  %s4157_s25 = smov [#allocation10]   ;;  %s689_s5 = int_to_ptr.vmem [resolvable:$true] %s688_s5 }
  0x8d   : > { %s712_s3 = sshll.u32 %s4157_s25, 4  ;;  %s3745_s27 = scalar_lea.vmem %s689_s5, 16  ;;  %s713_s3 = int_to_ptr.vmem [resolvable:$true] %s712_s3 }
  0x8e   : > { %p3746_p2 = scmp.ne.s32.totalorder %s689_s5, %s3745_s27  ;;  %s3752_s11 = scalar_lea.vmem %s689_s5, 32 }
  0x8f   : > { %p3753_p11 = scmp.lt.s32.totalorder %s689_s5, %s689_s5  ;;  %p3754_p12 = scmp.lt.s32.totalorder %s3752_s11, %s3745_s27 }
  0x90   : > { %p3748_p8 = pnand %p3746_p2, %p4362_p7 }
  0x91   : > { %3347 = dma.hbm_to_vmem [thread:$0]  (!%p4354_p6), %s4997_s16, 32, %s852_s23, [#allocation27], %s4957_s10, %s4957_s10, %s4151_s24  }
  0x92   : > { %p3749_p9 = pneg %p3748_p8  ;;  %p3755_p10 = por %p3754_p12, %p3753_p11 }
  0x94   : > { %p3756_p4 = pnand %p3755_p10, %p3749_p9 }
  0x96   : > { %3759 = shalt.err (!%p3756_p4)
}
  0x97   : > { %s4998_s6 = sld [smem:[#allocation48_spill]]  ;;  %s3771_s9 = scalar_lea.vmem %s713_s3, 16 }
  0x98   : > { %p3772_p13 = scmp.ne.s32.totalorder %s713_s3, %s3771_s9  ;;  %s3778_s25 = scalar_lea.vmem %s713_s3, 32 }
  0x99   : > { %p3779_p2 = scmp.lt.s32.totalorder %s713_s3, %s713_s3  ;;  %p3780_p8 = scmp.lt.s32.totalorder %s3778_s25, %s3771_s9 }
  0x9a   : > { %p3774_p5 = pnand %p3772_p13, %p4362_p7 }
  0x9b   : > { %p3781_p1 = por %p3780_p8, %p3779_p2 }
  0x9c   : > { %p3775_p0 = pneg %p3774_p5 }
  0x9d   : > { %3308 = dma.hbm_to_vmem [thread:$0]  (!%p4354_p6), %s4998_s6, 16, %s689_s5, [#allocation6]  }
  0x9e   : > { %p3782_p3 = pnand %p3781_p1, %p3775_p0 }
  0xa0   : > { %3785 = shalt.err (!%p3782_p3)
}
  0xa1   : > { %s4999_s26 = sld [smem:[#allocation50_spill]]  ;;  %s4158_s23 = smov [#allocation13]  }
  0xa2   : > { %s734_s5 = sshll.u32 %s4158_s23, 4  ;;  %s4159_s29 = smov [#allocation16]   ;;  %s735_s5 = int_to_ptr.vmem [resolvable:$true] %s734_s5 }
  0xa3   : > { %s760_s6 = sshll.u32 %s4159_s29, 4  ;;  %s3797_s10 = scalar_lea.vmem %s735_s5, 16  ;;  %s761_s6 = int_to_ptr.vmem [resolvable:$true] %s760_s6 }
  0xa4   : > { %p3798_p9 = scmp.ne.s32.totalorder %s735_s5, %s3797_s10  ;;  %s3804_s9 = scalar_lea.vmem %s735_s5, 32 }
  0xa5   : > { %p3805_p1 = scmp.lt.s32.totalorder %s735_s5, %s735_s5  ;;  %p3806_p3 = scmp.lt.s32.totalorder %s3804_s9, %s3797_s10 }
  0xa6   : > { %p3800_p11 = pnand %p3798_p9, %p4362_p7 }
  0xa7   : > { %3314 = dma.hbm_to_vmem [thread:$0]  (!%p4354_p6), %s4999_s26, 16, %s713_s3, [#allocation9]  }
  0xa8   : > { %p3801_p12 = pneg %p3800_p11  ;;  %p3807_p10 = por %p3806_p3, %p3805_p1 }
  0xaa   : > { %p3808_p4 = pnand %p3807_p10, %p3801_p12 }
  0xac   : > { %3811 = shalt.err (!%p3808_p4)
}
  0xad   : > { %s5000_s25 = sld [smem:[#allocation52_spill]]  ;;  %s3823_s27 = scalar_lea.vmem %s761_s6, 32 }
  0xae   : > { %p3824_p13 = scmp.ne.s32.totalorder %s761_s6, %s3823_s27  ;;  %p3831_p2 = scmp.lt.s32.totalorder %s761_s6, %s761_s6 }
  0xaf   : > { %p3832_p8 = scmp.lt.s32.totalorder %s3823_s27, %s3823_s27 }
  0xb0   : > { %p3826_p5 = pnand %p3824_p13, %p4362_p7 }
  0xb1   : > { %p3833_p9 = por %p3832_p8, %p3831_p2 }
  0xb2   : > { %p3827_p0 = pneg %p3826_p5 }
  0xb3   : > { %3320 = dma.hbm_to_vmem [thread:$0]  (!%p4354_p6), %s5000_s25, 16, %s735_s5, [#allocation12]  }
  0xb4   : > { %p3834_p11 = pnand %p3833_p9, %p3827_p0 }
  0xb6   : > { %3837 = shalt.err (!%p3834_p11)
}
  0xb7   : > { %s5001_s10 = smov 16   ;;  %s5002_s29 = sld [smem:[#allocation55_spill]] }
  0xb8   : > { %s4160_s5 = smov [#allocation19]   ;;  %s4161_s26 = smov [#allocation22]  }
  0xb9   : > { %s786_s9 = sshll.u32 %s4160_s5, 4  ;;  %s812_s3 = sshll.u32 %s4161_s26, 4  ;;  %s787_s9 = int_to_ptr.vmem [resolvable:$true] %s786_s9  ;;  %s813_s3 = int_to_ptr.vmem [resolvable:$true] %s812_s3 }
  0xba   : > { %s3849_s25 = scalar_lea.vmem %s787_s9, 512  ;;  %p3857_p10 = scmp.lt.s32.totalorder %s787_s9, %s787_s9 }
  0xbb   : > { %p3850_p12 = scmp.ne.s32.totalorder %s787_s9, %s3849_s25  ;;  %p3858_p4 = scmp.lt.s32.totalorder %s3849_s25, %s3849_s25 }
  0xbd   : > { %3326 = dma.hbm_to_vmem [thread:$0]  (!%p4354_p6), %s5002_s29, 32, %s761_s6, [#allocation15], %s5001_s10, %s5001_s10, %s4151_s24  }
  0xbe   : > { %p3852_p1 = pnand %p3850_p12, %p4362_p7  ;;  %p3859_p13 = por %p3858_p4, %p3857_p10 }
  0xc0   : > { %p3853_p3 = pneg %p3852_p1 }
  0xc2   : > { %p3860_p5 = pnand %p3859_p13, %p3853_p3 }
  0xc4   : > { %3863 = shalt.err (!%p3860_p5)
}
  0xc5   : > { %s5003_s27 = smov 4   ;;  %s5004_s6 = smov 64  }
  0xc6   : > { %s5005_s29 = sld [smem:[#allocation57_spill]]  ;;  %s3875_s5 = scalar_lea.vmem %s813_s3, 512 }
  0xc7   : > { %p3876_p0 = scmp.ne.s32.totalorder %s813_s3, %s3875_s5  ;;  %p3883_p9 = scmp.lt.s32.totalorder %s813_s3, %s813_s3 }
  0xc8   : > { %p3884_p11 = scmp.lt.s32.totalorder %s3875_s5, %s3875_s5 }
  0xc9   : > { %p3878_p2 = pnand %p3876_p0, %p4362_p7 }
  0xca   : > { %p3885_p12 = por %p3884_p11, %p3883_p9 }
  0xcb   : > { %p3879_p8 = pneg %p3878_p2 }
  0xcc   : > { %3332 = dma.hbm_to_vmem [thread:$0]  (!%p4354_p6), %s5005_s29, 512, %s787_s9, [#allocation18], %s5004_s6, %s5004_s6, %s5003_s27  }
  0xcd   : > { %p3886_p1 = pnand %p3885_p12, %p3879_p8 }
  0xcf   : > { %3889 = shalt.err (!%p3886_p1)
}
  0xd0   : > { %s5006_s13 = sld [smem:[#allocation59_spill]]  ;;  %s4162_s9 = smov [#allocation25]  }
  0xd1   : > { %s838_s11 = sshll.u32 %s4162_s9, 4  ;;  %s4163_s23 = smov [#allocation28]   ;;  %s839_s11 = int_to_ptr.vmem [resolvable:$true] %s838_s11 }
  0xd2   : > { %s864_s29 = sshll.u32 %s4163_s23, 4  ;;  %s3901_s5 = scalar_lea.vmem %s839_s11, 512  ;;  %s865_s29 = int_to_ptr.vmem [resolvable:$true] %s864_s29 }
  0xd3   : > { %p3902_p3 = scmp.ne.s32.totalorder %s839_s11, %s3901_s5  ;;  %p3909_p13 = scmp.lt.s32.totalorder %s839_s11, %s839_s11 }
  0xd4   : > { %p3910_p5 = scmp.lt.s32.totalorder %s3901_s5, %s3901_s5 }
  0xd5   : > { %p3904_p10 = pnand %p3902_p3, %p4362_p7 }
  0xd6   : > { %3338 = dma.hbm_to_vmem [thread:$0]  (!%p4354_p6), %s5006_s13, 512, %s813_s3, [#allocation21], %s5004_s6, %s5004_s6, %s5003_s27  }
  0xd7   : > { %p3905_p4 = pneg %p3904_p10  ;;  %p3911_p0 = por %p3910_p5, %p3909_p13 }
  0xd9   : > { %p3912_p2 = pnand %p3911_p0, %p3905_p4 }
  0xdb   : > { %3915 = shalt.err (!%p3912_p2)
}
  0xdc   : > { %s5007_s15 = sld [smem:[#allocation61_spill]]  ;;  %s3927_s25 = scalar_lea.vmem %s865_s29, 512 }
  0xdd   : > { %p3928_p8 = scmp.ne.s32.totalorder %s865_s29, %s3927_s25  ;;  %p3935_p12 = scmp.lt.s32.totalorder %s865_s29, %s865_s29 }
  0xde   : > { %p3936_p1 = scmp.lt.s32.totalorder %s3927_s25, %s3927_s25 }
  0xdf   : > { %p3930_p9 = pnand %p3928_p8, %p4362_p7 }
  0xe0   : > { %p3937_p3 = por %p3936_p1, %p3935_p12 }
  0xe1   : > { %p3931_p11 = pneg %p3930_p9 }
  0xe2   : > { %3344 = dma.hbm_to_vmem [thread:$0]  (!%p4354_p6), %s5007_s15, 512, %s839_s11, [#allocation24], %s5004_s6, %s5004_s6, %s5003_s27  }
  0xe3   : > { %p3938_p10 = pnand %p3937_p3, %p3931_p11 }
  0xe5   : > { %3941 = shalt.err (!%p3938_p10)
}
  0xe6   : > { %s5008_s17 = sld [smem:[#allocation63_spill]]  ;;  %s4164_s11 = smov [#allocation29]  }
  0xe7   : > { %s877_s5 = sshll.u32 %s4164_s11, 4  ;;  %s878_s5 = int_to_ptr.vmem [resolvable:$true] %s877_s5 }
  0xe8   : > { %s3953_s3 = scalar_lea.vmem %s878_s5, 32  ;;  %p3961_p0 = scmp.lt.s32.totalorder %s878_s5, %s878_s5 }
  0xe9   : > { %p3954_p4 = scmp.ne.s32.totalorder %s878_s5, %s3953_s3  ;;  %p3962_p2 = scmp.lt.s32.totalorder %s3953_s3, %s3953_s3 }
  0xeb   : > { %p3956_p13 = pnand %p3954_p4, %p4362_p7  ;;  %p3963_p8 = por %p3962_p2, %p3961_p0 }
  0xec   : > { %3350 = dma.hbm_to_vmem [thread:$0]  (!%p4354_p6), %s5008_s17, 512, %s865_s29, [#allocation27], %s5004_s6, %s5004_s6, %s5003_s27  }
  0xed   : > { %p3957_p5 = pneg %p3956_p13 }
  0xef   : > { %p3964_p9 = pnand %p3963_p8, %p3957_p5 }
  0xf1   : > { %3967 = shalt.err (!%p3964_p9)
}
  0xf2   : > { %s5009_s18 = sld [smem:[#allocation64_spill]]  ;;  %s2953_s1 = sadd.s32 4294967294, %s4134_s30  }
  0xf3   : > { %s4534_s2 = sadd.s32 1, %s4134_s30   ;;  %s63_s6 = sadd.s32 1, %s4130_s8 }
  0xf4   : > { %s60_s29 = ssub.s32 %s4134_s30, %s4534_s2  ;;  %p70_p7 = scmp.ne.s32.totalorder %s4130_s8, %s4126_s4 }
  0xf5   : > { %p61_p11 = scmp.eq.s32.totalorder %s60_s29, 0  ;;  %p71_p12 = scmp.eq.s32.totalorder %s4134_s30, 0 }
  0xf6   : > { %p76_p1 = scmp.ne.s32.totalorder %s4126_s4, %s4122_s7  ;;  %p625_p3 = scmp.eq.s32.totalorder %s4338_s28, 1 }
  0xf7   : > { %s4546_s25 = scalar_select %p61_p11, %s4130_s8, %s63_s6  }
  0xf8   : > { %3353 = dma.hbm_to_vmem [thread:$0]  (!%p4354_p6), %s5009_s18, 32, %s878_s5, [#allocation30], %s5001_s10, %s5001_s10, %s4151_s24  }
  0xf9   : > { %p72_p10 = por %p71_p12, %p70_p7  ;;  %p5010_p4 = scmp.eq.s32.totalorder %s4338_s28, 0 }
  0xfa   : > { %p4554_p6 = por %p625_p3, %p70_p7  ;;  %p631_p5 = scmp.eq.s32.totalorder %s2953_s1, 1 }
  0xfb   : > { %p4550_p13 = por %p5010_p4, %p76_p1  ;;  %p3382_p0 = scmp.lt.s32.totalorder %s4134_s30, 2 }
  0xfc   : > { %s5012_s24 = scalar_select %p4554_p6, 1, 0 }
  0xfd   : > { %s5011_s9 = scalar_select %p4550_p13, 1, 0 }
  0xfe   : > { %s912_s10 = sand.u32 1, %s4130_s8   ;;  %p4560_p2 = por %p631_p5, %p76_p1 }
  0xff   : > { %s2973_s11 = sshll.u32 %s912_s10, 3  ;;  %s2974_s5 = sshll.u32 %s4134_s30, 7 }
 0x100   : > { %s5013_s23 = scalar_select %p4560_p2, 1, 0 }
 0x101   : > { %s5014_s27 = sld [smem:[#allocation46_spill]]  ;;  %s916_s29 = scalar_lea.vmem [#allocation2], %s2973_s11 }
 0x102   : > { %s923_s12 = sshll.u32 %s916_s29, 4  ;;  %p4570_p8 = pnand %p3382_p0, %p72_p10  ;;  %s924_s12 = int_to_ptr.vmem [resolvable:$true] %s923_s12 }
 0x103   : > { %s913_s13 = scalar_lea.sflag [#allocation3], %s912_s10 }
 0x104   : > { %p3970_p7 = pneg %p4570_p8 }
 0x107   : > { %s4568_s6 = scalar_lea.hbm %s5014_s27, %s2974_s5  ;;  %s3973_s26 = scalar_lea.hbm %s5014_s27, 256 }
 0x108   : > { %s3968_s14 = scalar_lea.hbm %s4568_s6, 128  ;;  %p3974_p1 = scmp.lt.s32.totalorder %s4568_s6, %s5014_s27 }
 0x109   : > { %p3969_p9 = scmp.ne.s32.totalorder %s4568_s6, %s3968_s14  ;;  %p3975_p3 = scmp.lt.s32.totalorder %s3973_s26, %s3968_s14 }
 0x10b   : > { %p3971_p11 = pnand %p3970_p7, %p3969_p9  ;;  %p3976_p10 = por %p3975_p3, %p3974_p1 }
 0x10d   : > { %p3972_p12 = pneg %p3971_p11 }
 0x10f   : > { %p3977_p4 = pnand %p3976_p10, %p3972_p12 }
 0x111   : > { %3980 = shalt.err (!%p3977_p4)
}
 0x112   : > { %s3981_s29 = scalar_lea.vmem %s924_s12, 128  ;;  %s4165_s10 = smov [#allocation2]  }
 0x113   : > { %p3982_p5 = scmp.ne.s32.totalorder %s924_s12, %s3981_s29  ;;  %s3986_s16 = sshll.u32 %s4165_s10, 4  ;;  %s3987_s16 = int_to_ptr.vmem [resolvable:$false] %s3986_s16 }
 0x114   : > { %s3988_s17 = scalar_lea.vmem %s3987_s16, 256  ;;  %p3989_p9 = scmp.lt.s32.totalorder %s924_s12, %s3987_s16 }
 0x115   : > { %p3984_p0 = pnand %p3982_p5, %p3970_p7  ;;  %p3990_p11 = scmp.lt.s32.totalorder %s3988_s17, %s3981_s29 }
 0x117   : > { %p3985_p2 = pneg %p3984_p0  ;;  %p3991_p6 = por %p3990_p11, %p3989_p9 }
 0x119   : > { %p3992_p13 = pnand %p3991_p6, %p3985_p2 }
 0x11b   : > { %3995 = shalt.err (!%p3992_p13)
}
 0x11c   : > { %3357 = dma.hbm_to_vmem [thread:$0]  (!%p4570_p8), %s4568_s6, 128, %s924_s12, %s913_s13  }
 0x11d   : > { %p5016_p12 = scmp.ne.s32.totalorder %s4987_s0, 0 }
 0x11e   : > { %s4591_s14 = sand.u32 (!%p5016_p12), 1, %s4126_s4   ;;  %p5017_p6 = scmp.ne.s32.totalorder (!%p5016_p12), %s5011_s9, 0 }
 0x11f   : > { %932 = sbr.rel (%p5016_p12) target bundleno = 4220 (0x107c), region = 124  ;;  %s4594_s15 = sshll.u32 (!%p5016_p12), %s4591_s14, 3 }
 0x120   : > { %s935_s16 = scalar_lea.sflag (!%p5016_p12), [#allocation3], %s4591_s14  ;;  %s938_s17 = scalar_lea.vmem (!%p5016_p12), [#allocation2], %s4594_s15 }
 0x124   : > { %4073 = dma.done.wait (%p5017_p6), %s935_s16, 128  }
 0x125   : > { %4075 = vsyncadd (%p5017_p6), %s935_s16, 4294967168  ;;  %p5018_p13 = scmp.eq.s32.totalorder %s4338_s28, 0 }
 0x127   : > { %4077 = dma.done.wait (%p5018_p13), [#allocation6], 32   ;;  %p5019_p2 = pmov %p5018_p13 }
 0x129   : > { %4079 = vsyncadd (%p5019_p2), [#allocation6], 4294967264  ;;  %p5020_p8 = pmov %p5019_p2 }
 0x12a   : > { %p5021_p7 = pmov %p5019_p2 }
 0x12b   : > { %4081 = dma.done.wait (%p5020_p8), [#allocation9], 144  }
 0x12c   : > { %4083 = vsyncadd (%p5021_p7), [#allocation9], 4294967152  ;;  %p5022_p1 = pmov %p5019_p2 }
 0x12e   : > { %4085 = dma.done.wait (%p5022_p1), [#allocation12], 32   ;;  %p5023_p3 = pmov %p5022_p1 }
 0x12f   : > { %p5024_p10 = pmov %p5022_p1 }
 0x130   : > { %4087 = vsyncadd (%p5023_p3), [#allocation12], 4294967264 }
 0x131   : > { %4089 = dma.done.wait (%p5024_p10), [#allocation15], 64   ;;  %p5025_p4 = pmov %p5022_p1 }
 0x132   : > { %p5026_p5 = pmov %p5022_p1 }
 0x133   : > { %4091 = vsyncadd (%p5025_p4), [#allocation15], 4294967232 }
 0x134   : > { %4093 = dma.done.wait (%p5026_p5), [#allocation18], 544   ;;  %p5027_p0 = pmov %p5022_p1 }
 0x136   : > { %4095 = vsyncadd (%p5027_p0), [#allocation18], 4294966752  ;;  %p5028_p9 = pmov %p5027_p0 }
 0x137   : > { %p5029_p11 = pmov %p5027_p0 }
 0x138   : > { %4097 = dma.done.wait (%p5028_p9), [#allocation21], 544  }
 0x139   : > { %4099 = vsyncadd (%p5029_p11), [#allocation21], 4294966752  ;;  %p5030_p12 = pmov %p5027_p0 }
 0x13a   : > { %p5031_p6 = pmov %p5027_p0 }
 0x13b   : > { %4101 = dma.done.wait (%p5030_p12), [#allocation24], 544  }
 0x13c   : > { %4103 = vsyncadd (%p5031_p6), [#allocation24], 4294966752  ;;  %p5032_p13 = pmov %p5027_p0 }
 0x13d   : > { %p5033_p2 = pmov %p5027_p0 }
 0x13e   : > { %4105 = dma.done.wait (%p5032_p13), [#allocation27], 544  }
 0x13f   : > { %4107 = vsyncadd (%p5033_p2), [#allocation27], 4294966752  ;;  %p5034_p8 = pmov %p5027_p0 }
 0x140   : > { %p5035_p7 = pmov %p5027_p0 }
 0x141   : > { %4109 = dma.done.wait (%p5034_p8), [#allocation30], 32  }
 0x142   : > { %4111 = vsyncadd (%p5035_p7), [#allocation30], 4294967264  ;;  %vm1086_vm0 = vcmask 130048   ;;  %v1083_v0 = vld [vmem:[%s938_s17] sm:$0xff]  ;;  %v3479_v7 = vld [vmem:[#allocation8] sm:$0xff]   ;;  %v4166_v8 = vmov 0.0  }
 0x143   : > { %v1087_v1 = vsel %vm1086_vm0, %v1083_v0, 0.0  ;;  %3118 = vmatprep.subr.bf16.mxu0 %v4166_v8  ;;  %vm4167_vm1 = vmmov 0   ;;  %v2996_v13 = vld [vmem:[#allocation5] ss:$0 sm:$0xff]  ;;  %v2997_v15 = vld [vmem:[#allocation7] ss:$0 sm:$0xff] }
 0x144   : > { %1088 = vadd.xlane.f32.xlu0 %v1087_v1  ;;  %3120 = vmatprep.mubr.msk.bf16.mxu0 %vm4167_vm1, %v4166_v8  ;;  %v2998_v19 = vld [vmem:[#allocation10] ss:$0 sm:$0xff]  ;;  %vm1181_vm2 = vcmask 261120   ;;  %v3001_v40 = vld [vmem:[#allocation11] ss:$0 sm:$0xff]  ;;  %s1081_s13 = scalar_lea.vmem [#allocation32], %s4594_s15 }
 0x145   : > { %3119 = vmatpush3.bf16.msra.mxu0 %v3479_v7  ;;  %v3002_v42 = vld [vmem:[#allocation13] ss:$0 sm:$0xff]  ;;  %s4650_s0 = smov 0  }
 0x1cd   : > { %v1089_v2 = vpop.xlane.xlu0 %1088 }
 0x1ce   : > { %v1091_v3 = vmul.f32 0.0625, %v1089_v2 }
 0x1d0   : > { %v1092_v4 = vsub.f32 %v1083_v0, %v1091_v3 }
 0x1d2   : > { %v1093_v5 = vmul.f32 %v1092_v4, %v1092_v4 }
 0x1d4   : > { %v1094_v6 = vsel %vm1086_vm0, %v1093_v5, 0.0 }
 0x1d5   : > { %1095 = vadd.xlane.f32.xlu0 %v1094_v6 }
 0x25e   : > { %v1096_v9 = vpop.xlane.xlu0 %1095 }
 0x25f   : > { %v1097_v10 = vmul.f32 0.0625, %v1096_v9 }
 0x261   : > { %v1098_v11 = vadd.f32 1e-05, %v1097_v10 }
 0x263   : > { %3480 = vrsqrt.f32 %v1098_v11 }
 0x270   : > { %v3481_v12 = vpop.eup %3480 }
 0x271   : > { %v1100_v14 = vmul.f32 %v3481_v12, %v1092_v4 }
 0x273   : > { %v1107_v16 = vmul.f32 %v2996_v13, %v1100_v14 }
 0x275   : > { %v1114_v17 = vadd.f32 %v2997_v15, %v1107_v16 }
 0x277   : > { %v1115_v18 = vpack.c.bf16 %v1114_v17, %v1114_v17 }
 0x279   : > { %3121 = vmatmul.mubr.msk.bf16.vlgmr.msra.gmra.mxu0 %vm1086_vm0, %v1115_v18 }
 0x339   : > { %v1168_v20 = vpop.f32.mrf.mxu0 }
 0x33a   : > { %v1169_v21 = vadd.f32 %v2998_v19, %v1168_v20 }
 0x33b   : > { %v3122_v22 = vpop.f32.mrf.mxu0 }
 0x33c   : > { %v1175_v23 = vmul.f32 0.70710677, %v1169_v21  ;;  %v1174_v27 = vmul.f32 0.5, %v1169_v21 }
 0x33d   : > { %v1171_v24 = vpop.f32.mrf.mxu0 }
 0x33e   : > { %3482 = verf.f32 %v1175_v23 }
 0x33f   : > { %v3123_v25 = vpop.f32.mrf.mxu0 }
 0x34b   : > { %v3483_v26 = vpop.eup %3482 }
 0x34c   : > { %v1177_v28 = vadd.f32 1.0, %v3483_v26 }
 0x34e   : > { %v1178_v29 = vmul.f32 %v1177_v28, %v1174_v27 }
 0x350   : > { %v1182_v30 = vsel %vm1181_vm2, %v1178_v29, 0.0 }
 0x351   : > { %1183 = vadd.xlane.f32.xlu1 %v1182_v30 }
 0x3da   : > { %v1184_v31 = vpop.xlane.xlu1 %1183 }
 0x3db   : > { %v1186_v32 = vmul.f32 0.03125, %v1184_v31 }
 0x3dd   : > { %v1187_v33 = vsub.f32 %v1178_v29, %v1186_v32 }
 0x3df   : > { %v1188_v34 = vmul.f32 %v1187_v33, %v1187_v33 }
 0x3e1   : > { %v1189_v35 = vsel %vm1181_vm2, %v1188_v34, 0.0 }
 0x3e2   : > { %1190 = vadd.xlane.f32.xlu1 %v1189_v35 }
 0x46b   : > { %v1191_v36 = vpop.xlane.xlu1 %1190 }
 0x46c   : > { %v1192_v37 = vmul.f32 0.03125, %v1191_v36 }
 0x46e   : > { %v1193_v38 = vadd.f32 1e-05, %v1192_v37 }
 0x470   : > { %3484 = vrsqrt.f32 %v1193_v38 }
 0x47d   : > { %v3485_v39 = vpop.eup %3484 }
 0x47e   : > { %v1195_v41 = vmul.f32 %v3485_v39, %v1187_v33 }
 0x480   : > { %v1202_v43 = vmul.f32 %v3001_v40, %v1195_v41 }
 0x482   : > { %v1209_v44 = vadd.f32 %v3002_v42, %v1202_v43  }
 0x483 LB: >> { %v4168_v45 = vmov 0.0   ;;  %vm4169_vm3 = vmmov 0   ;;  %s4662_s9 = sshll.u32 %s4142_s0, 4  ;;  %v1217_v48 = vpack.c.bf16 %v4138_v44, %v4138_v44  ;;  %s1225_s1 = scalar_lea.vmem [#allocation20], %s4142_s0  ;;  %vm1304_vm4 = vcmask 64512   ;;  %s4142_s0 = sphi %s4650_s0, %s1215_s0   ;;  %v4138_v44 = vphi %v1209_v44, %v5037_v44  }
 0x484   : >> { %3124 = vmatprep.subr.bf16.mxu0 %v4168_v45  ;;  %3128 = vmatprep.mubr.msk.bf16.mxu0 %vm4169_vm3, %v4168_v45  ;;  %s1220_s6 = scalar_lea.vmem [#allocation19], %s4662_s9  ;;  %v3005_v49 = vld [vmem:[%s1225_s1] ss:$0 sm:$0xff]  ;;  %s4170_s5 = smov 104   ;;  %vm1972_vm5 = vcmask 1043456  }
 0x485   : >> { %3132 = vmatprep.subr.mxu1 %v4168_v45  ;;  %3134 = vmatprep.mubr.msk.f32.mxu1 %vm4169_vm3, %v4168_v45  ;;  %v3486_v46 = vld [vmem:[%s1220_s6 + $0x8] sm:$0xff]   ;;  %v3487_v47 = vld [vmem:[%s1220_s6] sm:$0xff]   ;;  %s4171_s3 = smov 120   ;;  %s4172_s26 = smov 96  }
 0x486   : >> { %3125 = vmatpush3.bf16.msra.mxu0 %v3486_v46  ;;  %s4173_s11 = smov 112   ;;  %s4174_s29 = smov 64  }
 0x487   : >> { %3126 = vmatprep.subr.bf16.mxu0 %v4168_v45  ;;  %s1964_s10 = scalar_lea.vmem [#allocation22], %s4662_s9  ;;  %s2161_s16 = scalar_lea.vmem [#allocation23], %s4142_s0 }
 0x488   : >> { %s2204_s17 = scalar_lea.vmem [#allocation25], %s4662_s9 }
 0x48a   : >> { %3127 = vmatpush3.bf16.msra.mxu0 %v3487_v47 }
 0x48b   : >> { %3147 = vmatprep.subr.mxu0 %v4168_v45 }
 0x48d   : >> { %3129 = vmatmul.mubr.msk.bf16.vlgmr.msra.gmra.mxu0 %vm1181_vm2, %v1217_v48 }
 0x48e   : >> { %3149 = vmatprep.mubr.msk.f32.mxu0 %vm4169_vm3, %v4168_v45 }
 0x54d   : >> { %v1282_v50 = vpop.f32.mrf.mxu0 }
 0x54e   : >> { %v4676_v51 = vadd.f32 %v3005_v49, %v1282_v50  ;;  %v1965_v49 = vld [vmem:[%s1964_s10] sm:$0xf] }
 0x54f   : >> { %v3130_v52 = vpop.f32.mrf.mxu0 }
 0x550   : >> { %1295 = vrot.lane.b32.xlu1 %v4676_v51, %s4170_s5  ;;  %1289 = vrot.lane.b32.xlu0 %v4676_v51, %s4171_s3  ;;  %v1298_v59 = vmul.f32 0.35355338, %v4676_v51  ;;  %s5036_s5 = sld [smem:[#allocation53_spill]] }
 0x551   : >> { %v1285_v53 = vpop.f32.mrf.mxu0 }
 0x553   : >> { %v3131_v54 = vpop.f32.mrf.mxu0 }
 0x554   : >> { %1302 = vrot.lane.b32.xlu1 %v4676_v51, %s4172_s26  ;;  %1292 = vrot.lane.b32.xlu0 %v4676_v51, %s4173_s11  ;;  %v1974_v54 = vsel %vm1972_vm5, %v1965_v49, 0  ;;  %s2279_s11 = scalar_lea.vmem [#allocation28], %s4662_s9  ;;  %s2284_s9 = scalar_lea.vmem [#allocation29], %s4142_s0 }
 0x556   : >> { %s2171_s3 = scalar_lea.vmem %s5036_s5, %s4142_s0 }
 0x557   : >> { %v3027_v49 = vld [vmem:[%s2171_s3] ss:$0 sm:$0xff] }
 0x5c2   : >> { %v4682_v55 = vpop.permute.xlu1 %1295  ;;  %v1290_v56 = vpop.permute.xlu0 %1289 }
 0x5c3   : >> { %1380 = vrot.lane.b32.xlu0 %v1290_v56, %s4172_s26  ;;  %v1299_v61 = vmul.f32 0.35355338, %v1290_v56  ;;  %v1301_v0 = vmul.f32 0.35355338, %v4682_v55 }
 0x5c6   : >> { %v1303_v57 = vpop.permute.xlu1 %1302  ;;  %v4684_v58 = vpop.permute.xlu0 %1292 }
 0x5c7   : >> { %3133 = vmatpush3.xpose.msk.msra.mxu1 %vm1304_vm4, %v1303_v57  ;;  %1534 = vrot.lane.b32.xlu0 %v4682_v55, %s4172_s26  ;;  %v1300_v1 = vmul.f32 0.35355338, %v4684_v58  ;;  %v1967_v57 = vld [vmem:[%s1964_s10 + $0x8] sm:$0xf] }
 0x5c8   : >> { %1457 = vrot.lane.b32.xlu1 %v4684_v58, %s4172_s26  ;;  %3137 = vmatprep.subr.mxu1 %v4168_v45  ;;  %s2173_s26 = scalar_lea.vmem [#allocation14], %s4142_s0 }
 0x5ca   : >> { %3135 = vmatmul.mubr.msk.f32.vlgmr.msra.gmra.mxu1 %vm1304_vm4, %v1298_v59 }
 0x5cb   : >> { %3139 = vmatprep.mubr.msk.f32.mxu1 %vm4169_vm3, %v4168_v45 }
 0x635   : >> { %v1381_v60 = vpop.permute.xlu0 %1380 }
 0x636   : >> { %3138 = vmatpush3.xpose.msk.msra.mxu1 %vm1304_vm4, %v1381_v60  ;;  %v2066_v60 = vsel %vm1972_vm5, %v1967_v57, 0 }
 0x637   : >> { %3142 = vmatprep.subr.mxu1 %v4168_v45 }
 0x639   : >> { %v1535_v62 = vpop.permute.xlu0 %1534  ;;  %3140 = vmatmul.mubr.msk.f32.vlgmr.msra.gmra.mxu1 %vm1304_vm4, %v1299_v61 }
 0x63a   : >> { %v1458_v63 = vpop.permute.xlu1 %1457  ;;  %3148 = vmatpush3.xpose.msk.msra.mxu0 %vm1304_vm4, %v1535_v62  ;;  %3144 = vmatprep.mubr.msk.f32.mxu1 %vm4169_vm3, %v4168_v45  ;;  %v1968_v62 = vld [vmem:[%s1964_s10 + $0xc] sm:$0xf] }
 0x63b   : >> { %3143 = vmatpush3.xpose.msk.msra.mxu1 %vm1304_vm4, %v1458_v63  ;;  %3157 = vmatprep.subr.mxu0 %v4168_v45 }
 0x63c   : >> { %3152 = vmatprep.subr.mxu1 %v4168_v45 }
 0x63d   : >> { %3150 = vmatmul.mubr.msk.f32.vlgmr.msra.gmra.mxu0 %vm1304_vm4, %v1301_v0 }
 0x63e   : >> { %3145 = vmatmul.mubr.msk.f32.vlgmr.msra.gmra.mxu1 %vm1304_vm4, %v1300_v1  ;;  %3159 = vmatprep.mubr.msk.f32.mxu0 %vm4169_vm3, %v4168_v45  ;;  %v2112_v1 = vsel %vm1972_vm5, %v1968_v62, 0 }
 0x63f   : >> { %3154 = vmatprep.mubr.msk.f32.mxu1 %vm4169_vm3, %v4168_v45 }
 0x68a   : >> { %v1376_v2 = vpop.f32.mrf.mxu1 }
 0x68b   : >> { %v1611_v3 = vsel %vm1304_vm4, %v1376_v2, -inf }
 0x68c   : >> { %1612 = vmax.xlane.f32.xlu1 %v1611_v3  ;;  %v3136_v4 = vpop.f32.mrf.mxu1 }
 0x6f9   : >> { %v1453_v5 = vpop.f32.mrf.mxu1 }
 0x6fa   : >> { %v1614_v6 = vsel %vm1304_vm4, %v1453_v5, -inf }
 0x6fb   : >> { %1615 = vmax.xlane.f32.xlu0 %v1614_v6  ;;  %v3141_v7 = vpop.f32.mrf.mxu1 }
 0x6fd   : >> { %v1607_v9 = vpop.f32.mrf.mxu0 }
 0x6fe   : >> { %v1530_v10 = vpop.f32.mrf.mxu1  ;;  %v1620_v11 = vsel %vm1304_vm4, %v1607_v9, -inf }
 0x6ff   : >> { %v1617_v12 = vsel %vm1304_vm4, %v1530_v10, -inf  ;;  %1621 = vmax.xlane.f32.xlu1 %v1620_v11  ;;  %v3151_v13 = vpop.f32.mrf.mxu0 }
 0x700   : >> { %1618 = vmax.xlane.f32.xlu0 %v1617_v12  ;;  %v3146_v14 = vpop.f32.mrf.mxu1 }
 0x710   : >> { %1731 = vrot.lane.b32.xlu1 %v1290_v56, %s4174_s29 }
 0x715   : >> { %v1613_v15 = vpop.xlane.xlu1 %1612 }
 0x716   : >> { %v1623_v16 = vsub.f32 %v1376_v2, %v1613_v15 }
 0x718   : >> { %v1627_v17 = vmul.f32 1.442695, %v1623_v16 }
 0x71a   : >> { %3492 = vpow2.f32 %v1627_v17 }
 0x727   : >> { %v3493_v18 = vpop.eup %3492 }
 0x728   : >> { %v1635_v19 = vsel %vm1304_vm4, %v3493_v18, 0.0 }
 0x729   : >> { %1636 = vadd.xlane.f32.xlu0 %v1635_v19 }
 0x73f   : >> { %1655 = vrot.lane.b32.xlu0 %v4676_v51, %s4174_s29 }
 0x784   : >> { %v1616_v20 = vpop.xlane.xlu0 %1615 }
 0x785   : >> { %v1624_v21 = vsub.f32 %v1453_v5, %v1616_v20 }
 0x787   : >> { %v1629_v22 = vmul.f32 1.442695, %v1624_v21 }
 0x788   : >> { %v1622_v23 = vpop.xlane.xlu1 %1621 }
 0x789   : >> { %3494 = vpow2.f32 %v1629_v22  ;;  %v1619_v24 = vpop.xlane.xlu0 %1618  ;;  %v1626_v25 = vsub.f32 %v1607_v9, %v1622_v23 }
 0x78a   : >> { %v1625_v26 = vsub.f32 %v1530_v10, %v1619_v24 }
 0x78b   : >> { %v1633_v27 = vmul.f32 1.442695, %v1626_v25 }
 0x78c   : >> { %v1631_v28 = vmul.f32 1.442695, %v1625_v26  ;;  %v1732_v29 = vpop.permute.xlu1 %1731 }
 0x78d   : >> { %3496 = vpow2.f32 %v1633_v27  ;;  %3158 = vmatpush3.msra.mxu0 %v1732_v29 }
 0x78e   : >> { %3498 = vpow2.f32 %v1631_v28  ;;  %3167 = vmatprep.subr.mxu0 %v4168_v45  ;;  %v3026_v28 = vld [vmem:[%s2161_s16] ss:$0 sm:$0xff]  ;;  %s2350_s16 = scalar_lea.vmem [#allocation17], %s4142_s0 }
 0x796   : >> { %v3495_v30 = vpop.eup %3494 }
 0x797   : >> { %v1638_v31 = vsel %vm1304_vm4, %v3495_v30, 0.0 }
 0x798   : >> { %1639 = vadd.xlane.f32.xlu1 %v1638_v31 }
 0x79a   : >> { %v3497_v32 = vpop.eup %3496 }
 0x79b   : >> { %v3499_v33 = vpop.eup %3498  ;;  %v1644_v34 = vsel %vm1304_vm4, %v3497_v32, 0.0 }
 0x79c   : >> { %v1641_v35 = vsel %vm1304_vm4, %v3499_v33, 0.0  ;;  %1645 = vadd.xlane.f32.xlu1 %v1644_v34 }
 0x79d   : >> { %1642 = vadd.xlane.f32.xlu0 %v1641_v35 }
 0x7ad   : >> { %1807 = vrot.lane.b32.xlu1 %v4684_v58, %s4174_s29 }
 0x7b2   : >> { %v1637_v36 = vpop.xlane.xlu0 %1636 }
 0x7b3   : >> { %1883 = vrot.lane.b32.xlu0 %v4682_v55, %s4174_s29  ;;  %3500 = vrcp.f32 %v1637_v36  ;;  %v1966_v55 = vld [vmem:[%s1964_s10 + $0x4] sm:$0xf]  ;;  %s2209_s29 = scalar_lea.vmem [#allocation26], %s4142_s0  ;;  %s2348_s10 = scalar_lea.vmem [#allocation16], %s4142_s0 }
 0x7b4   : >> { %v2020_v56 = vsel %vm1972_vm5, %v1966_v55, 0  ;;  %v3490_v55 = vld [vmem:[%s2279_s11 + $0x8] sm:$0xff]   ;;  %v3030_v57 = vld [vmem:[%s2209_s29] ss:$0 sm:$0xff]  ;;  %s1215_s0 = sadd.s32 1, %s4142_s0  }
 0x7b5   : >> { %p1212_p1 = scmp.ge.s32.totalorder %s1215_s0, 2  }
 0x7b6   : >> { %v1656_v37 = vpop.permute.xlu0 %1655  ;;  %s4961_s6 = sshll.u32 (%p1212_p1), %s4338_s28, 7  ;;  %s5039_s0 = sld [smem:[#allocation69_spill]] (%p1212_p1) }
 0x7b7   : >> { %3153 = vmatpush3.msra.mxu1 %v1656_v37  ;;  %s2639_s29 = scalar_lea.sflag (%p1212_p1), [#allocation33], %s4591_s14  ;;  %p5040_p10 = scmp.ne.s32.totalorder (%p1212_p1), %s5012_s24, 0 }
 0x7b8   : >> { %3162 = vmatprep.subr.mxu1 %v4168_v45 }
 0x7bc   : > { %s2663_s3 = scalar_lea.hbm (%p1212_p1), %s5039_s0, %s4961_s6 }
 0x7c0   : >> { %v3501_v38 = vpop.eup %3500 }
 0x7c1   : >> { %v1651_v39 = vmul.f32 %v3501_v38, %v3493_v18 }
 0x7c3   : >> { %3155 = vmatmul.mubr.msk.f32.vlgmr.msra.gmra.mxu1 %vm1304_vm4, %v1651_v39 }
 0x7c4   : >> { %3164 = vmatprep.mubr.msk.f32.mxu1 %vm4169_vm3, %v4168_v45 }
 0x821   : >> { %v1640_v40 = vpop.xlane.xlu1 %1639 }
 0x822   : >> { %3502 = vrcp.f32 %v1640_v40 }
 0x825   : >> { %v1646_v41 = vpop.xlane.xlu1 %1645 }
 0x826   : >> { %v1643_v42 = vpop.xlane.xlu0 %1642  ;;  %3504 = vrcp.f32 %v1646_v41 }
 0x827   : >> { %3506 = vrcp.f32 %v1643_v42  ;;  %v3488_v42 = vld [vmem:[%s2204_s17 + $0x8] sm:$0xff]  }
 0x829   : >> { %v1808_v43 = vpop.permute.xlu1 %1807 }
 0x82a   : >> { %3163 = vmatpush3.msra.mxu1 %v1808_v43  ;;  %v1884_v48 = vpop.permute.xlu0 %1883  ;;  %v3489_v43 = vld [vmem:[%s2204_s17] sm:$0xff]  }
 0x82b   : >> { %3172 = vmatprep.subr.bf16.mxu1 %v4168_v45 }
 0x82f   : >> { %v3503_v46 = vpop.eup %3502 }
 0x830   : >> { %v1652_v47 = vmul.f32 %v3503_v46, %v3495_v30 }
 0x832   : >> { %3160 = vmatmul.mubr.msk.f32.vlgmr.msra.gmra.mxu0 %vm1304_vm4, %v1652_v47 }
 0x833   : >> { %v3505_v50 = vpop.eup %3504  ;;  %3168 = vmatpush3.msra.mxu0 %v1884_v48  ;;  %3169 = vmatprep.mubr.msk.f32.mxu0 %vm4169_vm3, %v4168_v45 }
 0x834   : >> { %v3507_v51 = vpop.eup %3506  ;;  %v1654_v52 = vmul.f32 %v3505_v50, %v3497_v32  ;;  %3178 = vmatprep.subr.bf16.mxu0 %v4168_v45 }
 0x835   : >> { %v1653_v53 = vmul.f32 %v3507_v51, %v3499_v33  ;;  %v3028_v51 = vld [vmem:[%s2173_s26] ss:$0 sm:$0xff]  ;;  %s5038_s26 = sld [smem:[#allocation65_spill]] (%p1212_p1) }
 0x836   : >> { %3170 = vmatmul.mubr.msk.f32.vlgmr.msra.gmra.mxu0 %vm1304_vm4, %v1654_v52 }
 0x837   : >> { %3165 = vmatmul.mubr.msk.f32.vlgmr.msra.gmra.mxu1 %vm1304_vm4, %v1653_v53  ;;  %3180 = vmatprep.mubr.msk.bf16.mxu0 %vm4169_vm3, %v4168_v45 }
 0x838   : >> { %3173 = vmatpush3.bf16.msra.mxu1 %v1974_v54  ;;  %3174 = vmatprep.mubr.msk.bf16.mxu1 %vm4169_vm3, %v4168_v45 }
 0x839   : >> { %3184 = vmatprep.subr.bf16.mxu1 %v4168_v45  ;;  %3179 = vmatpush3.bf16.msra.mxu0 %v2020_v56  ;;  %v3491_v56 = vld [vmem:[%s2279_s11] sm:$0xff]   ;;  %s2665_s11 = sshll.u32 (%p1212_p1), %s1081_s13, 4  ;;  %s2666_s11 = int_to_ptr.vmem [resolvable:$true] %s2665_s11 }
 0x83a   : >> { %3190 = vmatprep.subr.bf16.mxu0 %v4168_v45 }
 0x883   : >> { %v1727_v58 = vpop.f32.mrf.mxu1 }
 0x884   : >> { %v1959_v59 = vpack.c.bf16 %v1727_v58, %v1727_v58 }
 0x885   : >> { %v3156_v61 = vpop.f32.mrf.mxu1 }
 0x886   : >> { %3175 = vmatmul.mubr.msk.bf16.vlgmr.msra.gmra.mxu1 %vm1304_vm4, %v1959_v59 }
 0x887   : >> { %3185 = vmatpush3.bf16.msra.mxu1 %v2066_v60  ;;  %3186 = vmatprep.mubr.msk.bf16.mxu1 %vm4169_vm3, %v4168_v45 }
 0x888   : >> { %3196 = vmatprep.subr.bf16.mxu1 %v4168_v45 }
 0x8f2   : >> { %v1803_v63 = vpop.f32.mrf.mxu0 }
 0x8f3   : >> { %v1960_v0 = vpack.c.bf16 %v1803_v63, %v1803_v63 }
 0x8f4   : >> { %v3161_v2 = vpop.f32.mrf.mxu0 }
 0x8f5   : >> { %3181 = vmatmul.mubr.msk.bf16.vlgmr.msra.gmra.mxu0 %vm1304_vm4, %v1960_v0 }
 0x8f6   : >> { %v1955_v3 = vpop.f32.mrf.mxu0  ;;  %3191 = vmatpush3.bf16.msra.mxu0 %v2112_v1  ;;  %3192 = vmatprep.mubr.msk.bf16.mxu0 %vm4169_vm3, %v4168_v45 }
 0x8f7   : >> { %v1879_v4 = vpop.f32.mrf.mxu1  ;;  %3204 = vmatprep.subr.bf16.mxu0 %v4168_v45  ;;  %v1962_v9 = vpack.c.bf16 %v1955_v3, %v1955_v3 }
 0x8f8   : >> { %v1961_v5 = vpack.c.bf16 %v1879_v4, %v1879_v4  ;;  %v3171_v6 = vpop.f32.mrf.mxu0 }
 0x8f9   : >> { %v3166_v7 = vpop.f32.mrf.mxu1 }
 0x8fa   : >> { %3187 = vmatmul.mubr.msk.bf16.vlgmr.msra.gmra.mxu1 %vm1304_vm4, %v1961_v5 }
 0x8fb   : >> { %3200 = vmatprep.mubr.msk.bf16.mxu1 %vm4169_vm3, %v4168_v45  ;;  %3197 = vmatpush3.bf16.msra.mxu1 %v3488_v42 }
 0x8fc   : >> { %3198 = vmatprep.subr.bf16.mxu1 %v4168_v45 }
 0x8fd   : >> { %3193 = vmatmul.mubr.msk.bf16.vlgmr.msra.gmra.mxu0 %vm1304_vm4, %v1962_v9 }
 0x8fe   : >> { %3208 = vmatprep.mubr.msk.bf16.mxu0 %vm4169_vm3, %v4168_v45  ;;  %3205 = vmatpush3.bf16.msra.mxu0 %v3490_v55 }
 0x8ff   : >> { %3199 = vmatpush3.bf16.msra.mxu1 %v3489_v43  ;;  %3206 = vmatprep.subr.bf16.mxu0 %v4168_v45  ;;  %v3035_v45 = vld [vmem:[%s2284_s9] ss:$0 sm:$0xff]  ;;  %s3996_s9 = scalar_lea.vmem (%p1212_p1), %s2666_s11, 128 }
 0x900   : > { %3220 = vmatprep.subr.bf16.mxu1 (%p1212_p1), %v4166_v8  ;;  %p3997_p3 = scmp.ne.s32.totalorder (%p1212_p1), %s2666_s11, %s3996_s9 }
 0x902   : >> { %3207 = vmatpush3.bf16.msra.mxu0 %v3491_v56  ;;  %p3998_p4 = pnand (%p1212_p1), %p3997_p3, %p5040_p10 }
 0x903   : > { %3212 = vmatprep.subr.bf16.mxu0 (%p1212_p1), %v4166_v8 }
 0x904   : > { %p3999_p5 = pneg (%p1212_p1), %p3998_p4 }
 0x946   : >> { %v2010_v10 = vpop.f32.mrf.mxu1 }
 0x947   : >> { %v2154_v18 = vsel %vm1181_vm2, %v2010_v10, 0.0 }
 0x948   : >> { %v3176_v11 = vpop.f32.mrf.mxu1 }
 0x94a   : >> { %v2013_v12 = vpop.f32.mrf.mxu1 }
 0x94c   : >> { %v3177_v13 = vpop.f32.mrf.mxu1 }
 0x9b5   : >> { %v2056_v14 = vpop.f32.mrf.mxu0 }
 0x9b6   : >> { %v2155_v16 = vsel %vm1181_vm2, %v2056_v14, 0.0 }
 0x9b7   : >> { %v3182_v15 = vpop.f32.mrf.mxu0  ;;  %v2156_v20 = vadd.f32 %v2155_v16, %v2154_v18 }
 0x9b9   : >> { %v2059_v17 = vpop.f32.mrf.mxu0 }
 0x9ba   : >> { %v2102_v19 = vpop.f32.mrf.mxu1 }
 0x9bb   : >> { %v2157_v21 = vsel %vm1181_vm2, %v2102_v19, 0.0  ;;  %v3183_v22 = vpop.f32.mrf.mxu0 }
 0x9bc   : >> { %v3188_v23 = vpop.f32.mrf.mxu1  ;;  %v2158_v24 = vadd.f32 %v2157_v21, %v2156_v20  ;;  %v3039_v22 = vld [vmem:[%s2348_s10] ss:$0 sm:$0xff]  ;;  %s4175_s10 = smov (%p1212_p1), [#allocation32]  }
 0x9bd   : >> { %v2148_v25 = vpop.f32.mrf.mxu0 }
 0x9be   : >> { %v2105_v26 = vpop.f32.mrf.mxu1  ;;  %v2159_v27 = vsel %vm1181_vm2, %v2148_v25, 0.0 }
 0x9bf   : >> { %v2160_v29 = vadd.f32 %v2159_v27, %v2158_v24  ;;  %v3194_v30 = vpop.f32.mrf.mxu0  ;;  %v3040_v24 = vld [vmem:[%s2350_s16] ss:$0 sm:$0xff]  ;;  %v3514_v27 = vld [vmem:[%s4937_s19 + $0x8] sm:$0xff] (%p1212_p1)   ;;  %s4000_s16 = sshll.u32 (%p1212_p1), %s4175_s10, 4  ;;  %s4001_s16 = int_to_ptr.vmem [resolvable:$false] %s4000_s16 }
 0x9c0   : >> { %v3189_v31 = vpop.f32.mrf.mxu1  ;;  %v3517_v30 = vld [vmem:[%s4937_s19 + $0x10] sm:$0xff] (%p1212_p1)   ;;  %s4002_s17 = scalar_lea.vmem (%p1212_p1), %s4001_s16, 256  ;;  %p4003_p0 = scmp.lt.s32.totalorder (%p1212_p1), %s2666_s11, %s4001_s16 }
 0x9c1   : >> { %v2169_v32 = vadd.f32 %v3026_v28, %v2160_v29  ;;  %v2151_v33 = vpop.f32.mrf.mxu0  ;;  %v3515_v28 = vld [vmem:[%s4937_s19 + $0x18] sm:$0xff] (%p1212_p1)   ;;  %v3516_v29 = vld [vmem:[%s4937_s19] sm:$0xff] (%p1212_p1)   ;;  %p4004_p9 = scmp.lt.s32.totalorder (%p1212_p1), %s4002_s17, %s3996_s9 }
 0x9c2   : > { %v3055_v33 = vld [vmem:[%s4938_s20 + $0x1] ss:$0 sm:$0xff] (%p1212_p1) }
 0x9c3   : >> { %v3195_v34 = vpop.f32.mrf.mxu0  ;;  %v2170_v35 = vadd.f32 %v4138_v44, %v2169_v32  ;;  %v3042_v32 = vld [vmem:[%s4938_s20] ss:$0 sm:$0xff] (%p1212_p1)  ;;  %p4005_p11 = por (%p1212_p1), %p4004_p9, %p4003_p0 }
 0x9c5   : >> { %v2175_v36 = vsel %vm1181_vm2, %v2170_v35, 0.0  ;;  %p4006_p12 = pnand (%p1212_p1), %p4005_p11, %p3999_p5 }
 0x9c6   : >> { %2176 = vadd.xlane.f32.xlu1 %v2175_v36 }
 0xa4f   : >> { %v2177_v37 = vpop.xlane.xlu1 %2176 }
 0xa50   : >> { %v2178_v38 = vmul.f32 0.03125, %v2177_v37 }
 0xa52   : >> { %v2179_v39 = vsub.f32 %v2170_v35, %v2178_v38 }
 0xa54   : >> { %v2180_v40 = vmul.f32 %v2179_v39, %v2179_v39 }
 0xa56   : >> { %v2181_v41 = vsel %vm1181_vm2, %v2180_v40, 0.0 }
 0xa57   : >> { %2182 = vadd.xlane.f32.xlu0 %v2181_v41 }
 0xae0   : >> { %v2183_v44 = vpop.xlane.xlu0 %2182 }
 0xae1   : >> { %v2184_v46 = vmul.f32 0.03125, %v2183_v44 }
 0xae3   : >> { %v2185_v47 = vadd.f32 1e-05, %v2184_v46 }
 0xae5   : >> { %3508 = vrsqrt.f32 %v2185_v47 }
 0xaf2   : >> { %v3509_v48 = vpop.eup %3508 }
 0xaf3   : >> { %v2187_v50 = vmul.f32 %v3509_v48, %v2179_v39 }
 0xaf5   : >> { %v2194_v52 = vmul.f32 %v3027_v49, %v2187_v50 }
 0xaf7   : >> { %v2201_v53 = vadd.f32 %v3028_v51, %v2194_v52 }
 0xaf9   : >> { %v2202_v54 = vpack.c.bf16 %v2201_v53, %v2201_v53 }
 0xafb   : >> { %3201 = vmatmul.mubr.msk.bf16.vlgmr.msra.gmra.mxu1 %vm1181_vm2, %v2202_v54 }
 0xafc   : > { %3224 = vmatprep.mubr.msk.bf16.mxu1 (%p1212_p1), %vm4167_vm1, %v4166_v8  ;;  %3221 = vmatpush3.bf16.msra.mxu1 (%p1212_p1), %v3515_v28 }
 0xafd   : > { %3222 = vmatprep.subr.bf16.mxu1 (%p1212_p1), %v4166_v8 }
 0xb00   : > { %3223 = vmatpush3.bf16.msra.mxu1 (%p1212_p1), %v3517_v30 }
 0xbbb   : >> { %v2266_v58 = vpop.f32.mrf.mxu1 }
 0xbbc   : >> { %v2267_v59 = vadd.f32 %v3030_v57, %v2266_v58 }
 0xbbd   : >> { %v3202_v60 = vpop.f32.mrf.mxu1 }
 0xbbe   : >> { %v2273_v61 = vmul.f32 0.70710677, %v2267_v59  ;;  %v2272_v1 = vmul.f32 0.5, %v2267_v59 }
 0xbbf   : >> { %v2269_v62 = vpop.f32.mrf.mxu1 }
 0xbc0   : >> { %3510 = verf.f32 %v2273_v61 }
 0xbc1   : >> { %v3203_v63 = vpop.f32.mrf.mxu1 }
 0xbcd   : >> { %v3511_v0 = vpop.eup %3510 }
 0xbce   : >> { %v2275_v2 = vadd.f32 1.0, %v3511_v0 }
 0xbd0   : >> { %v2276_v3 = vmul.f32 %v2275_v2, %v2272_v1 }
 0xbd2   : >> { %v2277_v4 = vpack.c.bf16 %v2276_v3, %v2276_v3 }
 0xbd4   : >> { %3209 = vmatmul.mubr.msk.bf16.vlgmr.msra.gmra.mxu0 %vm1181_vm2, %v2277_v4 }
 0xbd5   : > { %3216 = vmatprep.mubr.msk.bf16.mxu0 (%p1212_p1), %vm4167_vm1, %v4166_v8  ;;  %3213 = vmatpush3.bf16.msra.mxu0 (%p1212_p1), %v3514_v27 }
 0xbd6   : > { %3214 = vmatprep.subr.bf16.mxu0 (%p1212_p1), %v4166_v8 }
 0xbd9   : > { %3215 = vmatpush3.bf16.msra.mxu0 (%p1212_p1), %v3516_v29 }
 0xc94   : >> { %v2341_v5 = vpop.f32.mrf.mxu0 }
 0xc95   : >> { %v2342_v6 = vadd.f32 %v3035_v45, %v2341_v5 }
 0xc96   : >> { %v3210_v7 = vpop.f32.mrf.mxu0 }
 0xc97   : >> { %v2347_v9 = vadd.f32 %v2342_v6, %v2201_v53 }
 0xc98   : >> { %v2344_v10 = vpop.f32.mrf.mxu0 }
 0xc99   : >> { %v2352_v11 = vsel %vm1181_vm2, %v2347_v9, 0.0 }
 0xc9a   : >> { %2353 = vadd.xlane.f32.xlu0 %v2352_v11  ;;  %v3211_v12 = vpop.f32.mrf.mxu0  ;;  %v3047_v11 = vld [vmem:[%s4940_s22] ss:$0 sm:$0xff] (%p1212_p1) }
 0xd23   : >> { %v2354_v13 = vpop.xlane.xlu0 %2353 }
 0xd24   : >> { %v2355_v14 = vmul.f32 0.03125, %v2354_v13 }
 0xd26   : >> { %v2356_v15 = vsub.f32 %v2347_v9, %v2355_v14  ;;  %v3046_v9 = vld [vmem:[%s4939_s21] ss:$0 sm:$0xff] (%p1212_p1) }
 0xd27   : > { %v3048_v14 = vld [vmem:[%s5038_s26] ss:$0 sm:$0xff] (%p1212_p1) }
 0xd28   : >> { %v2357_v16 = vmul.f32 %v2356_v15, %v2356_v15 }
 0xd2a   : >> { %v2358_v17 = vsel %vm1181_vm2, %v2357_v16, 0.0 }
 0xd2b   : >> { %2359 = vadd.xlane.f32.xlu1 %v2358_v17 }
 0xdb4   : >> { %v2360_v18 = vpop.xlane.xlu1 %2359 }
 0xdb5   : >> { %v2361_v19 = vmul.f32 0.03125, %v2360_v18  ;;  %v3062_v18 = vld [vmem:[%s4940_s22 + $0x1] ss:$0 sm:$0xff] (%p1212_p1) }
 0xdb7   : >> { %v2362_v20 = vadd.f32 1e-05, %v2361_v19 }
 0xdb9   : >> { %3512 = vrsqrt.f32 %v2362_v20 }
 0xdc6   : >> { %v3513_v21 = vpop.eup %3512 }
 0xdc7   : >> { %v2364_v23 = vmul.f32 %v3513_v21, %v2356_v15  ;;  %v3061_v15 = vld [vmem:[%s4939_s21 + $0x1] ss:$0 sm:$0xff] (%p1212_p1) }
 0xdc8   : > { %v3064_v21 = vld [vmem:[%s5038_s26 + $0x1] ss:$0 sm:$0xff] (%p1212_p1) }
 0xdc9   : >> { %v2371_v25 = vmul.f32 %v3039_v22, %v2364_v23  ;;  %1214 = sbr.rel (!%p1212_p1) target bundleno = 1155 (0x483), region = 279 }
 0xdcb   : >> { %v2378_v26 = vadd.f32 %v3040_v24, %v2371_v25  }
 0xdcd   : >> { %v5037_v44 = vmov %v2378_v26  ;;  %2379 = vst.msk [vmem:[%s1081_s13] sm:$0xff] (%p1212_p1), %vm1181_vm2, %v2378_v26  ;;  %v2388_v31 = vpack.c.bf16 (%p1212_p1), %v2378_v26, %v2378_v26 }
 0xdcf   : > { %3217 = vmatmul.mubr.msk.bf16.vlgmr.msra.gmra.mxu0 %vm1181_vm2, %v2388_v31  ;;  %3225 = vmatmul.mubr.msk.bf16.vlgmr.msra.gmra.mxu1 %vm1181_vm2, %v2388_v31 }
 0xe8f   : > { %v2449_v34 = vpop.f32.mrf.mxu0  ;;  %v2568_v36 = vpop.f32.mrf.mxu1 }
 0xe90   : > { %v2450_v35 = vadd.f32 %v3042_v32, %v2449_v34  ;;  %v2569_v37 = vadd.f32 %v3055_v33, %v2568_v36 }
 0xe91   : > { %v3218_v8 = vpop.f32.mrf.mxu0  ;;  %v3226_v39 = vpop.f32.mrf.mxu1 }
 0xe92   : > { %v2456_v38 = vmul.f32 0.70710677, %v2450_v35  ;;  %v2575_v40 = vmul.f32 0.70710677, %v2569_v37  ;;  %v2455_v48 = vmul.f32 0.5, %v2450_v35  ;;  %v2574_v51 = vmul.f32 0.5, %v2569_v37 }
 0xe93   : > { %v2452_v41 = vpop.f32.mrf.mxu0  ;;  %v2571_v42 = vpop.f32.mrf.mxu1 }
 0xe94   : > { %3518 = verf.f32 %v2456_v38 }
 0xe95   : > { %3520 = verf.f32 %v2575_v40  ;;  %v3219_v43 = vpop.f32.mrf.mxu0  ;;  %v3227_v44 = vpop.f32.mrf.mxu1 }
 0xea1   : > { %v3519_v46 = vpop.eup %3518 }
 0xea2   : > { %v3521_v47 = vpop.eup %3520  ;;  %v2458_v49 = vadd.f32 1.0, %v3519_v46 }
 0xea3   : > { %v2577_v50 = vadd.f32 1.0, %v3521_v47 }
 0xea4   : > { %v2459_v52 = vmul.f32 %v2458_v49, %v2455_v48 }
 0xea5   : > { %v2578_v54 = vmul.f32 %v2577_v50, %v2574_v51 }
 0xea6   : > { %v2462_v53 = vsel %vm1181_vm2, %v2459_v52, 0.0 }
 0xea7   : > { %2463 = vadd.xlane.f32.xlu0 %v2462_v53  ;;  %v2583_v55 = vsel %vm1181_vm2, %v2578_v54, 0.0 }
 0xeab   : > { %2584 = vadd.xlane.f32.xlu0 %v2583_v55 }
 0xf30   : > { %v2464_v56 = vpop.xlane.xlu0 %2463 }
 0xf31   : > { %v2465_v57 = vmul.f32 0.03125, %v2464_v56 }
 0xf33   : > { %v2466_v58 = vsub.f32 %v2459_v52, %v2465_v57 }
 0xf34   : > { %v2585_v59 = vpop.xlane.xlu0 %2584 }
 0xf35   : > { %v2586_v60 = vmul.f32 0.03125, %v2585_v59  ;;  %v2467_v61 = vmul.f32 %v2466_v58, %v2466_v58 }
 0xf37   : > { %v2587_v62 = vsub.f32 %v2578_v54, %v2586_v60  ;;  %v2468_v63 = vsel %vm1181_vm2, %v2467_v61, 0.0 }
 0xf38   : > { %2469 = vadd.xlane.f32.xlu1 %v2468_v63 }
 0xf39   : > { %v2588_v0 = vmul.f32 %v2587_v62, %v2587_v62 }
 0xf3b   : > { %v2589_v1 = vsel %vm1181_vm2, %v2588_v0, 0.0 }
 0xf3c   : > { %2590 = vadd.xlane.f32.xlu1 %v2589_v1 }
 0xfc1   : > { %v2470_v2 = vpop.xlane.xlu1 %2469 }
 0xfc2   : > { %v2471_v3 = vmul.f32 0.03125, %v2470_v2 }
 0xfc4   : > { %v2472_v4 = vadd.f32 1e-05, %v2471_v3 }
 0xfc5   : > { %v2591_v45 = vpop.xlane.xlu1 %2590 }
 0xfc6   : > { %3522 = vrsqrt.f32 %v2472_v4  ;;  %v2592_v5 = vmul.f32 0.03125, %v2591_v45 }
 0xfc8   : > { %v2593_v6 = vadd.f32 1e-05, %v2592_v5 }
 0xfca   : > { %3524 = vrsqrt.f32 %v2593_v6 }
 0xfd3   : > { %v3523_v7 = vpop.eup %3522 }
 0xfd4   : > { %v2474_v10 = vmul.f32 %v3523_v7, %v2466_v58 }
 0xfd6   : > { %v2481_v12 = vmul.f32 %v3046_v9, %v2474_v10 }
 0xfd7   : > { %v3525_v13 = vpop.eup %3524 }
 0xfd8   : > { %v2488_v16 = vadd.f32 %v3047_v11, %v2481_v12  ;;  %v2595_v17 = vmul.f32 %v3525_v13, %v2587_v62 }
 0xfda   : > { %v2496_v19 = vmul.f32 %v3048_v14, %v2488_v16  ;;  %v2602_v20 = vmul.f32 %v3061_v15, %v2595_v17 }
 0xfdc   : > { %v2497_v22 = vsel %vm1181_vm2, %v2496_v19, 0.0  ;;  %v2609_v23 = vadd.f32 %v3062_v18, %v2602_v20 }
 0xfdd   : > { %2498 = vadd.xlane.f32.xlu0 %v2497_v22 }
 0xfde   : > { %v2618_v24 = vmul.f32 %v3064_v21, %v2609_v23 }
 0xfe0   : > { %v2619_v25 = vsel %vm1181_vm2, %v2618_v24, 0.0 }
 0xfe1   : > { %2620 = vadd.xlane.f32.xlu1 %v2619_v25 }
 0xfe2   : > { %4009 = shalt.err (!%p4006_p12)
}
 0xfe3   : > { %s4010_s1 = scalar_lea.hbm %s2663_s3, 128  ;;  %s4014_s6 = scalar_lea.hbm %s5039_s0, 256 }
 0xfe4   : > { %p4011_p6 = scmp.ne.s32.totalorder %s2663_s3, %s4010_s1  ;;  %p4015_p8 = scmp.lt.s32.totalorder %s2663_s3, %s5039_s0 }
 0xfe5   : > { %p4016_p7 = scmp.lt.s32.totalorder %s4014_s6, %s4010_s1 }
 0xfe6   : > { %p4012_p13 = pnand %p4011_p6, %p5040_p10 }
 0xfe7   : > { %p4017_p1 = por %p4016_p7, %p4015_p8 }
 0xfe8   : > { %p4013_p2 = pneg %p4012_p13 }
 0xfea   : > { %p4018_p3 = pnand %p4017_p1, %p4013_p2 }
 0xfec   : > { %4021 = shalt.err (!%p4018_p3)
}
 0xfed   : > { %3299 = dma.vmem_to_hbm [thread:$0]  (%p5040_p10), %s2666_s11, 128, %s2663_s3, %s2639_s29  }
 0xfee   : > { %s5041_s16 = sld [smem:[#allocation67_spill]]  ;;  %s5043_s13 = scalar_lea.vmem [#allocation31], %s4594_s15 }
 0xfef   : > { %s5042_s6 = sld [smem:[#allocation66_spill]]  ;;  %s2652_s5 = sshll.u32 %s5043_s13, 4  ;;  %s2653_s5 = int_to_ptr.vmem [resolvable:$true] %s2652_s5 }
 0xff0   : > { %s5044_s3 = sshll.u32 %s4338_s28, 7  ;;  %s5045_s9 = sld [smem:[#allocation68_spill]] }
 0xff1   : > { %s5046_s0 = smov %s5043_s13  ;;  %s2634_s18 = scalar_lea.sflag [#allocation4], %s4591_s14 }
 0xff2   : > { %s4022_s12 = scalar_lea.vmem %s2653_s5, 128 }
 0xff3   : > { %p4023_p4 = scmp.ne.s32.totalorder %s2653_s5, %s4022_s12 }
 0xff4   : > { %v3049_v26 = vld [vmem:[%s5041_s16] ss:$0 sm:$0xff]  ;;  %v3066_v30 = vld [vmem:[%s5041_s16 + $0x1] ss:$0 sm:$0xff] }
 0xff5   : > { %v3041_v29 = vld [vmem:[%s5042_s6] ss:$0 sm:$0xff]  ;;  %p4024_p5 = pnand %p4023_p4, %p5040_p10  ;;  %s4176_s6 = smov [#allocation31]  }
 0xff6   : > { %s2650_s10 = scalar_lea.hbm %s5045_s9, %s5044_s3  ;;  %s4026_s17 = sshll.u32 %s4176_s6, 4  ;;  %s4027_s17 = int_to_ptr.vmem [resolvable:$false] %s4026_s17 }
 0xff7   : > { %p4025_p0 = pneg %p4024_p5  ;;  %s4028_s1 = scalar_lea.vmem %s4027_s17, 256 }
 0xff8   : > { %p4029_p9 = scmp.lt.s32.totalorder %s2653_s5, %s4027_s17  ;;  %p4030_p11 = scmp.lt.s32.totalorder %s4028_s1, %s4022_s12 }
 0xffa   : > { %p4031_p12 = por %p4030_p11, %p4029_p9 }
 0xffc   : > { %p4032_p6 = pnand %p4031_p12, %p4025_p0 }
0x1066   : > { %v2499_v27 = vpop.xlane.xlu0 %2498 }
0x1067   : > { %v2507_v28 = vmul.f32 %v3049_v26, %v2499_v27 }
0x1069   : > { %v2508_v32 = vadd.f32 %v3041_v29, %v2507_v28 }
0x106a   : > { %v2621_v31 = vpop.xlane.xlu1 %2620 }
0x106b   : > { %v2630_v33 = vmul.f32 %v3066_v30, %v2621_v31 }
0x106d   : > { %v2631_v34 = vadd.f32 %v2630_v33, %v2508_v32 }
0x106f   : > { %2632 = vst [vmem:[%s5046_s0] sm:$0xff] %v2631_v34 }
0x1070   : > { %4035 = shalt.err (!%p4032_p6)
}
0x1071   : > { %s4036_s28 = scalar_lea.hbm %s2650_s10, 128  ;;  %s4040_s0 = scalar_lea.hbm %s5045_s9, 256 }
0x1072   : > { %p4037_p13 = scmp.ne.s32.totalorder %s2650_s10, %s4036_s28  ;;  %p4041_p7 = scmp.lt.s32.totalorder %s2650_s10, %s5045_s9 }
0x1073   : > { %p4042_p1 = scmp.lt.s32.totalorder %s4040_s0, %s4036_s28 }
0x1074   : > { %p4038_p2 = pnand %p4037_p13, %p5040_p10 }
0x1075   : > { %p4043_p3 = por %p4042_p1, %p4041_p7 }
0x1076   : > { %p4039_p8 = pneg %p4038_p2 }
0x1078   : > { %p4044_p4 = pnand %p4043_p3, %p4039_p8 }
0x107a   : > { %4047 = shalt.err (!%p4044_p4)
}
0x107b   : > { %3298 = dma.vmem_to_hbm [thread:$0]  (%p5040_p10), %s2653_s5, 128, %s2650_s10, %s2634_s18  }
0x107c PF: > { %s2677_s11 = sand.u32 1, %s4122_s7   ;;  %p5047_p5 = scmp.ne.s32.totalorder %s5013_s23, 0 }
0x107d   : > { %p5048_p0 = scmp.ge.s32.totalorder %s4134_s30, 2  ;;  %s2678_s29 = scalar_lea.sflag [#allocation4], %s2677_s11 }
0x107f   : > { %p3359_p9 = pnand %p5048_p0, %p5047_p5 }
0x1081   : > { %p3360_p11 = pneg %p3359_p9 }
0x1083   : > { %4113 = dma.done.wait (%p3360_p11), %s2678_s29, 128  }
0x1084   : > { %4115 = vsyncadd (%p3360_p11), %s2678_s29, 4294967168  ;;  %s2687_s12 = scalar_lea.sflag [#allocation33], %s2677_s11 }
0x1085   : > { %4117 = dma.done.wait (%p3360_p11), %s2687_s12, 128  }
0x1086   : > { %4119 = vsyncadd (%p3360_p11), %s2687_s12, 4294967168  ;;  %p53_p10 = scmp.ge.s32.totalorder %s4534_s2, 4   ;;  %s5049_s7 = smov %s4126_s4 }
0x1087   : > { %s5050_s4 = smov %s4130_s8  ;;  %s5051_s8 = smov %s4546_s25 }
0x1088   : > { %s5052_s30 = smov %s4534_s2  ;;  %55 = sbr.rel (!%p53_p10) target bundleno = 41 (0x29), region = 290 }
0x108d   :  { %2692 = vsyncpa [#allocation3], 1 }
0x108e   :  { %2694 = vsyncpa [#allocation3 + $0x1], 1 }
0x108f   :  { %2695 = vsyncpa [#allocation6], 1 }
0x1090   :  { %2696 = vsyncpa [#allocation9], 1 }
0x1091   :  { %2697 = vsyncpa [#allocation12], 1 }
0x1092   :  { %2698 = vsyncpa [#allocation15], 1 }
0x1093   :  { %2699 = vsyncpa [#allocation18], 1 }
0x1094   :  { %2700 = vsyncpa [#allocation21], 1 }
0x1095   :  { %2701 = vsyncpa [#allocation24], 1 }
0x1096   :  { %2702 = vsyncpa [#allocation27], 1 }
0x1097   :  { %2703 = vsyncpa [#allocation30], 1 }
0x1098   :  { %2704 = vsyncpa [#allocation4], 1 }
0x1099   :  { %2706 = vsyncpa [#allocation4 + $0x1], 1 }
0x109a   :  { %2707 = vsyncpa [#allocation33], 1 }
0x109b   :  { %2709 = vsyncpa [#allocation33 + $0x1], 1 }

</bundles_post_ra>
